<compile_context>
chip_gen: v7x
topology: tpu7x:2x2x1
jax: 0.10.0
libtpu: 0.0.40
codegen_flags: <defaults>
</compile_context>

<pallas_src>
import functools
import math

import jax
import jax.numpy as jnp
from jax import lax
from jax.experimental import pallas as pl
from jax.experimental.pallas import tpu as pltpu

CONST = 10000
NEG_BIG = -1e30                 # finite "-inf" for the additive mask bias
MATMUL_DTYPE = jnp.float32      # set to jnp.bfloat16 on v6e/v7x (see TODO above)


# ---------------------------------------------------------------------------
# Fused kernel: pos-encode + all decoder layers + final LayerNorm
# grid = (batch, layer); output block (b, 0, 0) is the VMEM-resident activation.
# ---------------------------------------------------------------------------
def fused_decoder_kernel(
    x_ref, enc_ref, pe_ref, cap_bias_ref, vid_bias_ref, lnf_g_ref, lnf_b_ref,
    ln1_g_ref, ln1_b_ref, ln2_g_ref, ln2_b_ref, ln3_g_ref, ln3_b_ref,
    sa_wq_ref, sa_bq_ref, sa_wo_ref, sa_bo_ref,
    ed_wq_ref, ed_bq_ref, ed_wo_ref, ed_bo_ref,
    ff_w1_ref, ff_b1_ref, ff_w2_ref, ff_b2_ref,
    out_ref,
    *, num_heads, head_dim, embed_scale,
):
    f32 = jnp.float32
    l = pl.program_id(1)
    n_layers = pl.num_programs(1)

    # Layer 0: positional encoding (dropout = identity at inference).
    @pl.when(l == 0)
    def _():
        out_ref[0] = (x_ref[0].astype(f32) * embed_scale
                      + pe_ref[0].astype(f32)).astype(out_ref.dtype)

    x = out_ref[0].astype(f32)          # (Lq, D) running activation (VMEM-resident)
    enc = enc_ref[0].astype(f32)        # (Lenc, D)
    cap_bias = cap_bias_ref[0]          # (Lq, Lq)   additive mask bias (0 / -1e30)
    vid_bias = vid_bias_ref[0]          # (Lq, Lenc)
    attn_scale = 1.0 / math.sqrt(head_dim)

    def layer_norm(v, g, b):
        mu = jnp.mean(v, axis=-1, keepdims=True)
        var = jnp.mean((v - mu) ** 2, axis=-1, keepdims=True)
        return (v - mu) * lax.rsqrt(var + 1e-5) * g + b

    def mm(a, b):
        return jnp.dot(a.astype(MATMUL_DTYPE), b.astype(MATMUL_DTYPE),
                       preferred_element_type=f32)

    def mha(q_in, kv_in, wq_t, bq, wo_t, bo, bias):
        # Flat, lane-dense projections: (L, D) @ (D, D).
        q = mm(q_in, wq_t) + bq                       # (Lq, D)
        k = mm(kv_in, wq_t) + bq                      # (Lk, D)
        # Reference bug preserved: V projection uses q_transform too -> V == K.
        ctx_heads = []
        for h in range(num_heads):                    # static unroll, H small
            lo, hi = h * head_dim, (h + 1) * head_dim
            qh = q[:, lo:hi]                          # (Lq, hd) static lane slice
            kh = k[:, lo:hi]                          # (Lk, hd)
            e = lax.dot_general(qh.astype(MATMUL_DTYPE), kh.astype(MATMUL_DTYPE),
                                (((1,), (1,)), ((), ())),
                                preferred_element_type=f32)       # (Lq, Lk)
            e = e * attn_scale + bias
            m = jnp.max(e, axis=-1, keepdims=True)
            p = jnp.exp(e - m)
            p = p * pl.reciprocal(jnp.sum(p, axis=-1, keepdims=True), approx=True)
            ctx_heads.append(mm(p, kh))               # (Lq, hd), v == k
        ctx = jnp.concatenate(ctx_heads, axis=-1)     # (Lq, D), head-major lanes
        # Single flat output projection (K = D), no per-head sum.
        return mm(ctx, wo_t) + bo

    # --- block 1: self attention (+ residual) ---
    xn = layer_norm(x, ln1_g_ref[...], ln1_b_ref[...])
    x = x + mha(xn, xn, sa_wq_ref[...], sa_bq_ref[...],
                sa_wo_ref[...], sa_bo_ref[...], cap_bias)

    # --- block 2: encoder-decoder attention (+ residual) ---
    xn = layer_norm(x, ln2_g_ref[...], ln2_b_ref[...])
    x = x + mha(xn, enc, ed_wq_ref[...], ed_bq_ref[...],
                ed_wo_ref[...], ed_bo_ref[...], vid_bias)

    # --- block 3: position-wise feed forward (+ residual) ---
    xn = layer_norm(x, ln3_g_ref[...], ln3_b_ref[...])
    h1 = jnp.maximum(mm(xn, ff_w1_ref[...]) + ff_b1_ref[...], 0.0)
    x = x + mm(h1, ff_w2_ref[...]) + ff_b2_ref[...]

    # Final LayerNorm fused into the last layer step.
    @pl.when(l == n_layers - 1)
    def _():
        out_ref[0] = layer_norm(x, lnf_g_ref[...], lnf_b_ref[...]).astype(out_ref.dtype)

    @pl.when(l < n_layers - 1)
    def _():
        out_ref[0] = x.astype(out_ref.dtype)


# ---------------------------------------------------------------------------
# Host-side parameter prep (run ONCE, hoisted out of the forward pass):
# transpose torch [out,in] weights and stack per-layer params on a layer axis.
# ---------------------------------------------------------------------------
STACKED_KEYS = (
    "ln1_g", "ln1_b", "ln2_g", "ln2_b", "ln3_g", "ln3_b",
    "sa_wq_t", "sa_bq", "sa_wo_t", "sa_bo",
    "ed_wq_t", "ed_bq", "ed_wo_t", "ed_bo",
    "ff_w1_t", "ff_b1", "ff_w2_t", "ff_b2",
)


def prepare_decoder_params(params):
    layers = params["layers"]
    t = lambda a: jnp.transpose(a, (1, 0))

    def stack(key, xf=lambda a: a):
        return jnp.stack([xf(p[key]) for p in layers], axis=0)

    prep = {
        "ln1_g": stack("ln1_g"), "ln1_b": stack("ln1_b"),
        "ln2_g": stack("ln2_g"), "ln2_b": stack("ln2_b"),
        "ln3_g": stack("ln3_g"), "ln3_b": stack("ln3_b"),
        "sa_wq_t": stack("sa_wq", t), "sa_bq": stack("sa_bq"),
        "sa_wo_t": stack("sa_wo", t), "sa_bo": stack("sa_bo"),
        "ed_wq_t": stack("ed_wq", t), "ed_bq": stack("ed_bq"),
        "ed_wo_t": stack("ed_wo", t), "ed_bo": stack("ed_bo"),
        "ff_w1_t": stack("ff_w1", t), "ff_b1": stack("ff_b1"),
        "ff_w2_t": stack("ff_w2", t), "ff_b2": stack("ff_b2"),
        "lnf_g": params["ln_g"], "lnf_b": params["ln_b"],
        "pos_embed": params["pos_embed"],
    }
    return prep


# ---------------------------------------------------------------------------
# Forward wrapper: one pallas_call for the whole decoder.
# ---------------------------------------------------------------------------
def decoder_forward(captions_emb, enc_out, vid_mask, cap_mask, prep, num_heads):
    B, Lq, D = captions_emb.shape
    Lenc = enc_out.shape[1]
    num_layers = prep["ln1_g"].shape[0]
    head_dim = D // num_heads

    # Additive mask biases (finite -1e30 instead of -inf; see header note).
    cap_bias = jnp.where(cap_mask != 0, NEG_BIG, 0.0).astype(jnp.float32)
    vid_bias = jnp.where(vid_mask != 0, NEG_BIG, 0.0).astype(jnp.float32)
    pe = prep["pos_embed"][:, :Lq, :]

    stacked = [prep[k] for k in STACKED_KEYS]   # each (num_layers, r, c)

    kernel = functools.partial(fused_decoder_kernel, num_heads=num_heads,
                               head_dim=head_dim, embed_scale=math.sqrt(D))

    in_specs = [
        pl.BlockSpec((1, Lq, D), lambda b, l: (b, 0, 0)),       # x (read at l==0)
        pl.BlockSpec((1, Lenc, D), lambda b, l: (b, 0, 0)),     # enc_out
        pl.BlockSpec((1, Lq, D), lambda b, l: (0, 0, 0)),       # pos_embed slice
        pl.BlockSpec((1, Lq, Lq), lambda b, l: (b, 0, 0)),      # cap mask bias
        pl.BlockSpec((1, Lq, Lenc), lambda b, l: (b, 0, 0)),    # vid mask bias
        pl.BlockSpec((1, D), lambda b, l: (0, 0)),              # final ln gamma
        pl.BlockSpec((1, D), lambda b, l: (0, 0)),              # final ln beta
    ] + [
        # Per-layer stacked params: leading layer dim squeezed, pipelined over l.
        pl.BlockSpec((None, a.shape[1], a.shape[2]), lambda b, l: (l, 0, 0))
        for a in stacked
    ]

    return pl.pallas_call(
        kernel,
        out_shape=jax.ShapeDtypeStruct((B, Lq, D), captions_emb.dtype),
        grid=(B, num_layers),
        in_specs=in_specs,
        # Same block index across the layer axis -> activation stays VMEM-resident.
        out_specs=pl.BlockSpec((1, Lq, D), lambda b, l: (b, 0, 0)),
        compiler_params=pltpu.CompilerParams(
            dimension_semantics=("parallel", "arbitrary")),
    )(captions_emb, enc_out, pe, cap_bias, vid_bias,
      prep["lnf_g"], prep["lnf_b"], *stacked)


# ---------------------------------------------------------------------------
# Pure-JAX reference (mirrors the PyTorch Decoder.forward) for self-check
# ---------------------------------------------------------------------------
def ref_decoder_forward(captions_emb, enc_out, vid_mask, cap_mask, params, num_heads):
    B, Lq, D = captions_emb.shape
    hd = D // num_heads
    x = captions_emb * math.sqrt(D) + params["pos_embed"][:, :Lq]

    def ln(v, g, b):
        mu = v.mean(-1, keepdims=True)
        var = ((v - mu) ** 2).mean(-1, keepdims=True)
        return (v - mu) / jnp.sqrt(var + 1e-5) * g + b

    def mha(q_in, kv_in, wq, bq, wo, bo, mask):
        Bq, L, _ = q_in.shape
        Lk = kv_in.shape[1]
        q = q_in @ wq.T + bq
        k = kv_in @ wq.T + bq
        v = kv_in @ wq.T + bq
        q = q.reshape(Bq, L, num_heads, hd).transpose(0, 2, 1, 3)
        k = k.reshape(Bq, Lk, num_heads, hd).transpose(0, 2, 1, 3)
        v = v.reshape(Bq, Lk, num_heads, hd).transpose(0, 2, 1, 3)
        e = jnp.einsum("bhqd,bhkd->bhqk", q, k) / math.sqrt(hd)
        e = jnp.where(mask[:, None] != 0, -jnp.inf, e)
        a = jax.nn.softmax(e, axis=-1)
        o = jnp.einsum("bhqk,bhkd->bhqd", a, v)
        o = o.transpose(0, 2, 1, 3).reshape(Bq, L, D)
        return o @ wo.T + bo

    for p in params["layers"]:
        xn = ln(x, p["ln1_g"], p["ln1_b"])
        x = x + mha(xn, xn, p["sa_wq"], p["sa_bq"], p["sa_wo"], p["sa_bo"], cap_mask)
        xn = ln(x, p["ln2_g"], p["ln2_b"])
        x = x + mha(xn, enc_out, p["ed_wq"], p["ed_bq"], p["ed_wo"], p["ed_bo"], vid_mask)
        xn = ln(x, p["ln3_g"], p["ln3_b"])
        h1 = jnp.maximum(xn @ p["ff_w1"].T + p["ff_b1"], 0.0)
        x = x + h1 @ p["ff_w2"].T + p["ff_b2"]

    return ln(x, params["ln_g"], params["ln_b"])


# ---------------------------------------------------------------------------
# Main
# ---------------------------------------------------------------------------
if __name__ == "__main__":
    B, Lq, Lenc = 2, 8, 16
    D, H, HIDDEN = 32, 4, 64
    NUM_LAYERS, MAX_LEN = 2, 16

    key = jax.random.PRNGKey(0)

    def w(k, shape, s=0.05):
        return (s * jax.random.normal(k, shape)).astype(jnp.float32)

    def make_layer(k):
        ks = jax.random.split(k, 18)
        return {
            "ln1_g": 1.0 + w(ks[0], (1, D), 0.01), "ln1_b": w(ks[1], (1, D), 0.01),
            "ln2_g": 1.0 + w(ks[2], (1, D), 0.01), "ln2_b": w(ks[3], (1, D), 0.01),
            "ln3_g": 1.0 + w(ks[4], (1, D), 0.01), "ln3_b": w(ks[5], (1, D), 0.01),
            # q_transform + final_projection (K/V projections unused by the
            # reference forward, so not materialized)
            "sa_wq": w(ks[6], (D, D)), "sa_bq": w(ks[7], (1, D)),
            "sa_wo": w(ks[8], (D, D)), "sa_bo": w(ks[9], (1, D)),
            "ed_wq": w(ks[10], (D, D)), "ed_bq": w(ks[11], (1, D)),
            "ed_wo": w(ks[12], (D, D)), "ed_bo": w(ks[13], (1, D)),
            "ff_w1": w(ks[14], (HIDDEN, D)), "ff_b1": w(ks[15], (1, HIDDEN)),
            "ff_w2": w(ks[16], (D, HIDDEN)), "ff_b2": w(ks[17], (1, D)),
        }

    k_layers, k_ln, k_x, k_enc = jax.random.split(key, 4)
    layer_keys = jax.random.split(k_layers, NUM_LAYERS)
    kg, kb = jax.random.split(k_ln)

    # positional embedding table, exactly as PositionalEncoder builds it
    pos = jnp.arange(MAX_LEN, dtype=jnp.float32)[:, None]
    two_j = jnp.arange(0, D, 2, dtype=jnp.float32)[None, :]
    angle = pos / jnp.power(float(CONST), two_j / D)
    pos_embed = jnp.zeros((1, MAX_LEN, D), jnp.float32)
    pos_embed = pos_embed.at[0, :, 0::2].set(jnp.sin(angle))
    pos_embed = pos_embed.at[0, :, 1::2].set(jnp.cos(angle))

    params = {
        "layers": [make_layer(k) for k in layer_keys],
        "ln_g": 1.0 + w(kg, (1, D), 0.01),
        "ln_b": w(kb, (1, D), 0.01),
        "pos_embed": pos_embed,
    }

    x = jax.random.normal(k_x, (B, Lq, D), dtype=jnp.float32)
    enc_out = jax.random.normal(k_enc, (B, Lenc, D), dtype=jnp.float32)

    # cap_mask: causal mask over decoder positions (1 = masked out)
    cap_mask = jnp.broadcast_to(
        jnp.triu(jnp.ones((Lq, Lq), jnp.float32), k=1), (B, Lq, Lq))
    # vid_mask: batch 1 masks the last 4 encoder positions, batch 0 none
    vid_row = jnp.concatenate(
        [jnp.zeros((Lenc - 4,), jnp.float32), jnp.ones((4,), jnp.float32)])
    vid_mask = jnp.stack(
        [jnp.zeros((Lq, Lenc), jnp.float32),
         jnp.broadcast_to(vid_row, (Lq, Lenc))], axis=0)

    # Parameter prep hoisted: done once, outside the forward pass.
    prep = prepare_decoder_params(params)

    forward = jax.jit(functools.partial(decoder_forward, num_heads=H))
    out = forward(x, enc_out, vid_mask, cap_mask, prep)
    out = jax.block_until_ready(out)

    ref = ref_decoder_forward(x, enc_out, vid_mask, cap_mask, params, num_heads=H)
    assert out.shape == (B, Lq, D)
    max_err = jnp.max(jnp.abs(out - ref))
    assert jnp.allclose(out, ref, atol=1e-3, rtol=1e-3), (
        f"mismatch vs JAX reference (max abs err {max_err})")

    print("KERNEL_OK")
</pallas_src>

<mosaic_0001>
module attributes {stable_mosaic.version = 11 : i64} {
  func.func @fused_decoder_kernel(%arg0: i32, %arg1: i32, %arg2: memref<1x8x32xf32, #tpu.memory_space<vmem>>, %arg3: memref<1x16x32xf32, #tpu.memory_space<vmem>>, %arg4: memref<1x8x32xf32, #tpu.memory_space<vmem>>, %arg5: memref<1x8x8xf32, #tpu.memory_space<vmem>>, %arg6: memref<1x8x16xf32, #tpu.memory_space<vmem>>, %arg7: memref<1x32xf32, #tpu.memory_space<vmem>>, %arg8: memref<1x32xf32, #tpu.memory_space<vmem>>, %arg9: memref<1x1x32xf32, #tpu.memory_space<vmem>>, %arg10: memref<1x1x32xf32, #tpu.memory_space<vmem>>, %arg11: memref<1x1x32xf32, #tpu.memory_space<vmem>>, %arg12: memref<1x1x32xf32, #tpu.memory_space<vmem>>, %arg13: memref<1x1x32xf32, #tpu.memory_space<vmem>>, %arg14: memref<1x1x32xf32, #tpu.memory_space<vmem>>, %arg15: memref<1x32x32xf32, #tpu.memory_space<vmem>>, %arg16: memref<1x1x32xf32, #tpu.memory_space<vmem>>, %arg17: memref<1x32x32xf32, #tpu.memory_space<vmem>>, %arg18: memref<1x1x32xf32, #tpu.memory_space<vmem>>, %arg19: memref<1x32x32xf32, #tpu.memory_space<vmem>>, %arg20: memref<1x1x32xf32, #tpu.memory_space<vmem>>, %arg21: memref<1x32x32xf32, #tpu.memory_space<vmem>>, %arg22: memref<1x1x32xf32, #tpu.memory_space<vmem>>, %arg23: memref<1x32x64xf32, #tpu.memory_space<vmem>>, %arg24: memref<1x1x64xf32, #tpu.memory_space<vmem>>, %arg25: memref<1x64x32xf32, #tpu.memory_space<vmem>>, %arg26: memref<1x1x32xf32, #tpu.memory_space<vmem>>, %arg27: memref<1x8x32xf32, #tpu.memory_space<vmem>>) attributes {dimension_semantics = [#tpu.dimension_semantics<parallel>, #tpu.dimension_semantics<arbitrary>], iteration_bounds = array<i64: 2, 2>, scalar_prefetch = 0 : i64, scratch_operands = 0 : i64, tpu.core_type = #tpu.core_type<tc>, window_params = [{transform_indices = @transform_0, window_bounds = array<i64: 1, 8, 32>}, {transform_indices = @transform_1, window_bounds = array<i64: 1, 16, 32>}, {pipeline_mode = #tpu.pipeline_mode<synchronous>, transform_indices = @transform_2, window_bounds = array<i64: 1, 8, 32>}, {transform_indices = @transform_3, window_bounds = array<i64: 1, 8, 8>}, {transform_indices = @transform_4, window_bounds = array<i64: 1, 8, 16>}, {pipeline_mode = #tpu.pipeline_mode<synchronous>, transform_indices = @transform_5, window_bounds = array<i64: 1, 32>}, {pipeline_mode = #tpu.pipeline_mode<synchronous>, transform_indices = @transform_6, window_bounds = array<i64: 1, 32>}, {transform_indices = @transform_7, window_bounds = array<i64: 1, 1, 32>}, {transform_indices = @transform_8, window_bounds = array<i64: 1, 1, 32>}, {transform_indices = @transform_9, window_bounds = array<i64: 1, 1, 32>}, {transform_indices = @transform_10, window_bounds = array<i64: 1, 1, 32>}, {transform_indices = @transform_11, window_bounds = array<i64: 1, 1, 32>}, {transform_indices = @transform_12, window_bounds = array<i64: 1, 1, 32>}, {transform_indices = @transform_13, window_bounds = array<i64: 1, 32, 32>}, {transform_indices = @transform_14, window_bounds = array<i64: 1, 1, 32>}, {transform_indices = @transform_15, window_bounds = array<i64: 1, 32, 32>}, {transform_indices = @transform_16, window_bounds = array<i64: 1, 1, 32>}, {transform_indices = @transform_17, window_bounds = array<i64: 1, 32, 32>}, {transform_indices = @transform_18, window_bounds = array<i64: 1, 1, 32>}, {transform_indices = @transform_19, window_bounds = array<i64: 1, 32, 32>}, {transform_indices = @transform_20, window_bounds = array<i64: 1, 1, 32>}, {transform_indices = @transform_21, window_bounds = array<i64: 1, 32, 64>}, {transform_indices = @transform_22, window_bounds = array<i64: 1, 1, 64>}, {transform_indices = @transform_23, window_bounds = array<i64: 1, 64, 32>}, {transform_indices = @transform_24, window_bounds = array<i64: 1, 1, 32>}, {transform_indices = @transform_25, window_bounds = array<i64: 1, 8, 32>}]} {
    %c0_i32 = arith.constant 0 : i32
    %0 = arith.cmpi eq, %arg1, %c0_i32 : i32
    %1 = arith.extui %0 : i1 to i32
    %c0_i32_0 = arith.constant 0 : i32
    %2 = arith.cmpi ne, %1, %c0_i32_0 : i32
    scf.if %2 {
      %c0_132 = arith.constant 0 : index
      %c0_133 = arith.constant 0 : index
      %c0_134 = arith.constant 0 : index
      %286 = vector.load %arg2[%c0_132, %c0_133, %c0_134] : memref<1x8x32xf32, #tpu.memory_space<vmem>>, vector<1x8x32xf32>
      %287 = vector.shape_cast %286 : vector<1x8x32xf32> to vector<8x32xf32>
      %cst_135 = arith.constant 5.65685415 : f32
      %288 = vector.broadcast %cst_135 : f32 to vector<8x32xf32>
      %289 = arith.mulf %287, %288 : vector<8x32xf32>
      %c0_136 = arith.constant 0 : index
      %c0_137 = arith.constant 0 : index
      %c0_138 = arith.constant 0 : index
      %290 = vector.load %arg4[%c0_136, %c0_137, %c0_138] : memref<1x8x32xf32, #tpu.memory_space<vmem>>, vector<1x8x32xf32>
      %291 = vector.shape_cast %290 : vector<1x8x32xf32> to vector<8x32xf32>
      %292 = arith.addf %289, %291 : vector<8x32xf32>
      %c0_139 = arith.constant 0 : index
      %c0_140 = arith.constant 0 : index
      %c0_141 = arith.constant 0 : index
      %293 = vector.load %arg27[%c0_139, %c0_140, %c0_141] : memref<1x8x32xf32, #tpu.memory_space<vmem>>, vector<1x8x32xf32>
      %294 = vector.shape_cast %293 : vector<1x8x32xf32> to vector<8x32xf32>
      %295 = vector.shape_cast %292 : vector<8x32xf32> to vector<1x8x32xf32>
      tpu.vector_store %arg27[%c0_139, %c0_140, %c0_141], %295 {strides = array<i32>} : memref<1x8x32xf32, #tpu.memory_space<vmem>>, vector<1x8x32xf32>,
    } else {
    }
    %c0 = arith.constant 0 : index
    %c0_1 = arith.constant 0 : index
    %c0_2 = arith.constant 0 : index
    %3 = vector.load %arg27[%c0, %c0_1, %c0_2] : memref<1x8x32xf32, #tpu.memory_space<vmem>>, vector<1x8x32xf32>
    %4 = vector.shape_cast %3 : vector<1x8x32xf32> to vector<8x32xf32>
    %c0_3 = arith.constant 0 : index
    %c0_4 = arith.constant 0 : index
    %c0_5 = arith.constant 0 : index
    %5 = vector.load %arg3[%c0_3, %c0_4, %c0_5] : memref<1x16x32xf32, #tpu.memory_space<vmem>>, vector<1x16x32xf32>
    %6 = vector.shape_cast %5 : vector<1x16x32xf32> to vector<16x32xf32>
    %c0_6 = arith.constant 0 : index
    %c0_7 = arith.constant 0 : index
    %c0_8 = arith.constant 0 : index
    %7 = vector.load %arg5[%c0_6, %c0_7, %c0_8] : memref<1x8x8xf32, #tpu.memory_space<vmem>>, vector<1x8x8xf32>
    %8 = vector.shape_cast %7 : vector<1x8x8xf32> to vector<8x8xf32>
    %c0_9 = arith.constant 0 : index
    %c0_10 = arith.constant 0 : index
    %c0_11 = arith.constant 0 : index
    %9 = vector.load %arg6[%c0_9, %c0_10, %c0_11] : memref<1x8x16xf32, #tpu.memory_space<vmem>>, vector<1x8x16xf32>
    %10 = vector.shape_cast %9 : vector<1x8x16xf32> to vector<8x16xf32>
    %c0_12 = arith.constant 0 : index
    %c0_13 = arith.constant 0 : index
    %c0_14 = arith.constant 0 : index
    %11 = vector.load %arg9[%c0_12, %c0_13, %c0_14] : memref<1x1x32xf32, #tpu.memory_space<vmem>>, vector<1x1x32xf32>
    %12 = vector.shape_cast %11 : vector<1x1x32xf32> to vector<1x32xf32>
    %c0_15 = arith.constant 0 : index
    %c0_16 = arith.constant 0 : index
    %c0_17 = arith.constant 0 : index
    %13 = vector.load %arg10[%c0_15, %c0_16, %c0_17] : memref<1x1x32xf32, #tpu.memory_space<vmem>>, vector<1x1x32xf32>
    %14 = vector.shape_cast %13 : vector<1x1x32xf32> to vector<1x32xf32>
    %cst = arith.constant dense<0.000000e+00> : vector<8xf32>
    %15 = vector.multi_reduction <add>, %4, %cst [1] : vector<8x32xf32> to vector<8xf32>
    %16 = vector.shape_cast %15 : vector<8xf32> to vector<8x1xf32>
    %cst_18 = arith.constant 3.200000e+01 : f32
    %17 = vector.broadcast %cst_18 : f32 to vector<8x1xf32>
    %18 = arith.divf %16, %17 : vector<8x1xf32>
    %19 = vector.broadcast %18 : vector<8x1xf32> to vector<8x32xf32>
    %20 = arith.subf %4, %19 : vector<8x32xf32>
    %21 = arith.mulf %20, %20 : vector<8x32xf32>
    %cst_19 = arith.constant dense<0.000000e+00> : vector<8xf32>
    %22 = vector.multi_reduction <add>, %21, %cst_19 [1] : vector<8x32xf32> to vector<8xf32>
    %23 = vector.shape_cast %22 : vector<8xf32> to vector<8x1xf32>
    %cst_20 = arith.constant 3.200000e+01 : f32
    %24 = vector.broadcast %cst_20 : f32 to vector<8x1xf32>
    %25 = arith.divf %23, %24 : vector<8x1xf32>
    %26 = vector.broadcast %18 : vector<8x1xf32> to vector<8x32xf32>
    %27 = arith.subf %4, %26 : vector<8x32xf32>
    %cst_21 = arith.constant 9.99999974E-6 : f32
    %28 = vector.broadcast %cst_21 : f32 to vector<8x1xf32>
    %29 = arith.addf %25, %28 : vector<8x1xf32>
    %30 = math.rsqrt %29 : vector<8x1xf32>
    %31 = vector.broadcast %30 : vector<8x1xf32> to vector<8x32xf32>
    %32 = arith.mulf %27, %31 : vector<8x32xf32>
    %33 = vector.broadcast %12 : vector<1x32xf32> to vector<8x32xf32>
    %34 = arith.mulf %32, %33 : vector<8x32xf32>
    %35 = vector.broadcast %14 : vector<1x32xf32> to vector<8x32xf32>
    %36 = arith.addf %34, %35 : vector<8x32xf32>
    %c0_22 = arith.constant 0 : index
    %c0_23 = arith.constant 0 : index
    %c0_24 = arith.constant 0 : index
    %37 = vector.load %arg15[%c0_22, %c0_23, %c0_24] : memref<1x32x32xf32, #tpu.memory_space<vmem>>, vector<1x32x32xf32>
    %38 = vector.shape_cast %37 : vector<1x32x32xf32> to vector<32x32xf32>
    %c0_25 = arith.constant 0 : index
    %c0_26 = arith.constant 0 : index
    %c0_27 = arith.constant 0 : index
    %39 = vector.load %arg16[%c0_25, %c0_26, %c0_27] : memref<1x1x32xf32, #tpu.memory_space<vmem>>, vector<1x1x32xf32>
    %40 = vector.shape_cast %39 : vector<1x1x32xf32> to vector<1x32xf32>
    %c0_28 = arith.constant 0 : index
    %c0_29 = arith.constant 0 : index
    %c0_30 = arith.constant 0 : index
    %41 = vector.load %arg17[%c0_28, %c0_29, %c0_30] : memref<1x32x32xf32, #tpu.memory_space<vmem>>, vector<1x32x32xf32>
    %42 = vector.shape_cast %41 : vector<1x32x32xf32> to vector<32x32xf32>
    %c0_31 = arith.constant 0 : index
    %c0_32 = arith.constant 0 : index
    %c0_33 = arith.constant 0 : index
    %43 = vector.load %arg18[%c0_31, %c0_32, %c0_33] : memref<1x1x32xf32, #tpu.memory_space<vmem>>, vector<1x1x32xf32>
    %44 = vector.shape_cast %43 : vector<1x1x32xf32> to vector<1x32xf32>
    %cst_34 = arith.constant dense<0.000000e+00> : vector<8x32xf32>
    %45 = tpu.matmul %36, %38, %cst_34 {dimension_numbers = #tpu.dot_dimension_numbers<[1], [0], [0], [1], [0, 0, 1, 1], [], []>} : vector<8x32xf32>, vector<32x32xf32>, vector<8x32xf32> -> vector<8x32xf32>
    %46 = vector.broadcast %40 : vector<1x32xf32> to vector<8x32xf32>
    %47 = arith.addf %45, %46 : vector<8x32xf32>
    %cst_35 = arith.constant dense<0.000000e+00> : vector<8x32xf32>
    %48 = tpu.matmul %36, %38, %cst_35 {dimension_numbers = #tpu.dot_dimension_numbers<[1], [0], [0], [1], [0, 0, 1, 1], [], []>} : vector<8x32xf32>, vector<32x32xf32>, vector<8x32xf32> -> vector<8x32xf32>
    %49 = vector.broadcast %40 : vector<1x32xf32> to vector<8x32xf32>
    %50 = arith.addf %48, %49 : vector<8x32xf32>
    %51 = vector.extract_strided_slice %47 {offsets = [0, 0], sizes = [8, 8], strides = [1, 1]} : vector<8x32xf32> to vector<8x8xf32>
    %52 = vector.extract_strided_slice %50 {offsets = [0, 0], sizes = [8, 8], strides = [1, 1]} : vector<8x32xf32> to vector<8x8xf32>
    %cst_36 = arith.constant dense<0.000000e+00> : vector<8x8xf32>
    %53 = tpu.matmul %51, %52, %cst_36 {dimension_numbers = #tpu.dot_dimension_numbers<[1], [1], [0], [0], [0, 0, 1, 0], [], []>} : vector<8x8xf32>, vector<8x8xf32>, vector<8x8xf32> -> vector<8x8xf32>
    %cst_37 = arith.constant 0.353553385 : f32
    %54 = vector.broadcast %cst_37 : f32 to vector<8x8xf32>
    %55 = arith.mulf %53, %54 : vector<8x8xf32>
    %56 = arith.addf %55, %8 : vector<8x8xf32>
    %cst_38 = arith.constant dense<0xFF800000> : vector<8xf32>
    %57 = vector.multi_reduction <maximumf>, %56, %cst_38 [1] : vector<8x8xf32> to vector<8xf32>
    %58 = vector.shape_cast %57 : vector<8xf32> to vector<8x1xf32>
    %59 = vector.broadcast %58 : vector<8x1xf32> to vector<8x8xf32>
    %60 = arith.subf %56, %59 : vector<8x8xf32>
    %61 = math.exp %60 : vector<8x8xf32>
    %cst_39 = arith.constant dense<0.000000e+00> : vector<8xf32>
    %62 = vector.multi_reduction <add>, %61, %cst_39 [1] : vector<8x8xf32> to vector<8xf32>
    %63 = vector.shape_cast %62 : vector<8xf32> to vector<8x1xf32>
    %64 = tpu.reciprocal %63 {approx = true} : vector<8x1xf32> -> vector<8x1xf32>
    %65 = vector.broadcast %64 : vector<8x1xf32> to vector<8x8xf32>
    %66 = arith.mulf %61, %65 : vector<8x8xf32>
    %cst_40 = arith.constant dense<0.000000e+00> : vector<8x8xf32>
    %67 = tpu.matmul %66, %52, %cst_40 {dimension_numbers = #tpu.dot_dimension_numbers<[1], [0], [0], [1], [0, 0, 1, 1], [], []>} : vector<8x8xf32>, vector<8x8xf32>, vector<8x8xf32> -> vector<8x8xf32>
    %68 = vector.extract_strided_slice %47 {offsets = [0, 8], sizes = [8, 8], strides = [1, 1]} : vector<8x32xf32> to vector<8x8xf32>
    %69 = vector.extract_strided_slice %50 {offsets = [0, 8], sizes = [8, 8], strides = [1, 1]} : vector<8x32xf32> to vector<8x8xf32>
    %cst_41 = arith.constant dense<0.000000e+00> : vector<8x8xf32>
    %70 = tpu.matmul %68, %69, %cst_41 {dimension_numbers = #tpu.dot_dimension_numbers<[1], [1], [0], [0], [0, 0, 1, 0], [], []>} : vector<8x8xf32>, vector<8x8xf32>, vector<8x8xf32> -> vector<8x8xf32>
    %cst_42 = arith.constant 0.353553385 : f32
    %71 = vector.broadcast %cst_42 : f32 to vector<8x8xf32>
    %72 = arith.mulf %70, %71 : vector<8x8xf32>
    %73 = arith.addf %72, %8 : vector<8x8xf32>
    %cst_43 = arith.constant dense<0xFF800000> : vector<8xf32>
    %74 = vector.multi_reduction <maximumf>, %73, %cst_43 [1] : vector<8x8xf32> to vector<8xf32>
    %75 = vector.shape_cast %74 : vector<8xf32> to vector<8x1xf32>
    %76 = vector.broadcast %75 : vector<8x1xf32> to vector<8x8xf32>
    %77 = arith.subf %73, %76 : vector<8x8xf32>
    %78 = math.exp %77 : vector<8x8xf32>
    %cst_44 = arith.constant dense<0.000000e+00> : vector<8xf32>
    %79 = vector.multi_reduction <add>, %78, %cst_44 [1] : vector<8x8xf32> to vector<8xf32>
    %80 = vector.shape_cast %79 : vector<8xf32> to vector<8x1xf32>
    %81 = tpu.reciprocal %80 {approx = true} : vector<8x1xf32> -> vector<8x1xf32>
    %82 = vector.broadcast %81 : vector<8x1xf32> to vector<8x8xf32>
    %83 = arith.mulf %78, %82 : vector<8x8xf32>
    %cst_45 = arith.constant dense<0.000000e+00> : vector<8x8xf32>
    %84 = tpu.matmul %83, %69, %cst_45 {dimension_numbers = #tpu.dot_dimension_numbers<[1], [0], [0], [1], [0, 0, 1, 1], [], []>} : vector<8x8xf32>, vector<8x8xf32>, vector<8x8xf32> -> vector<8x8xf32>
    %85 = vector.extract_strided_slice %47 {offsets = [0, 16], sizes = [8, 8], strides = [1, 1]} : vector<8x32xf32> to vector<8x8xf32>
    %86 = vector.extract_strided_slice %50 {offsets = [0, 16], sizes = [8, 8], strides = [1, 1]} : vector<8x32xf32> to vector<8x8xf32>
    %cst_46 = arith.constant dense<0.000000e+00> : vector<8x8xf32>
    %87 = tpu.matmul %85, %86, %cst_46 {dimension_numbers = #tpu.dot_dimension_numbers<[1], [1], [0], [0], [0, 0, 1, 0], [], []>} : vector<8x8xf32>, vector<8x8xf32>, vector<8x8xf32> -> vector<8x8xf32>
    %cst_47 = arith.constant 0.353553385 : f32
    %88 = vector.broadcast %cst_47 : f32 to vector<8x8xf32>
    %89 = arith.mulf %87, %88 : vector<8x8xf32>
    %90 = arith.addf %89, %8 : vector<8x8xf32>
    %cst_48 = arith.constant dense<0xFF800000> : vector<8xf32>
    %91 = vector.multi_reduction <maximumf>, %90, %cst_48 [1] : vector<8x8xf32> to vector<8xf32>
    %92 = vector.shape_cast %91 : vector<8xf32> to vector<8x1xf32>
    %93 = vector.broadcast %92 : vector<8x1xf32> to vector<8x8xf32>
    %94 = arith.subf %90, %93 : vector<8x8xf32>
    %95 = math.exp %94 : vector<8x8xf32>
    %cst_49 = arith.constant dense<0.000000e+00> : vector<8xf32>
    %96 = vector.multi_reduction <add>, %95, %cst_49 [1] : vector<8x8xf32> to vector<8xf32>
    %97 = vector.shape_cast %96 : vector<8xf32> to vector<8x1xf32>
    %98 = tpu.reciprocal %97 {approx = true} : vector<8x1xf32> -> vector<8x1xf32>
    %99 = vector.broadcast %98 : vector<8x1xf32> to vector<8x8xf32>
    %100 = arith.mulf %95, %99 : vector<8x8xf32>
    %cst_50 = arith.constant dense<0.000000e+00> : vector<8x8xf32>
    %101 = tpu.matmul %100, %86, %cst_50 {dimension_numbers = #tpu.dot_dimension_numbers<[1], [0], [0], [1], [0, 0, 1, 1], [], []>} : vector<8x8xf32>, vector<8x8xf32>, vector<8x8xf32> -> vector<8x8xf32>
    %102 = vector.extract_strided_slice %47 {offsets = [0, 24], sizes = [8, 8], strides = [1, 1]} : vector<8x32xf32> to vector<8x8xf32>
    %103 = vector.extract_strided_slice %50 {offsets = [0, 24], sizes = [8, 8], strides = [1, 1]} : vector<8x32xf32> to vector<8x8xf32>
    %cst_51 = arith.constant dense<0.000000e+00> : vector<8x8xf32>
    %104 = tpu.matmul %102, %103, %cst_51 {dimension_numbers = #tpu.dot_dimension_numbers<[1], [1], [0], [0], [0, 0, 1, 0], [], []>} : vector<8x8xf32>, vector<8x8xf32>, vector<8x8xf32> -> vector<8x8xf32>
    %cst_52 = arith.constant 0.353553385 : f32
    %105 = vector.broadcast %cst_52 : f32 to vector<8x8xf32>
    %106 = arith.mulf %104, %105 : vector<8x8xf32>
    %107 = arith.addf %106, %8 : vector<8x8xf32>
    %cst_53 = arith.constant dense<0xFF800000> : vector<8xf32>
    %108 = vector.multi_reduction <maximumf>, %107, %cst_53 [1] : vector<8x8xf32> to vector<8xf32>
    %109 = vector.shape_cast %108 : vector<8xf32> to vector<8x1xf32>
    %110 = vector.broadcast %109 : vector<8x1xf32> to vector<8x8xf32>
    %111 = arith.subf %107, %110 : vector<8x8xf32>
    %112 = math.exp %111 : vector<8x8xf32>
    %cst_54 = arith.constant dense<0.000000e+00> : vector<8xf32>
    %113 = vector.multi_reduction <add>, %112, %cst_54 [1] : vector<8x8xf32> to vector<8xf32>
    %114 = vector.shape_cast %113 : vector<8xf32> to vector<8x1xf32>
    %115 = tpu.reciprocal %114 {approx = true} : vector<8x1xf32> -> vector<8x1xf32>
    %116 = vector.broadcast %115 : vector<8x1xf32> to vector<8x8xf32>
    %117 = arith.mulf %112, %116 : vector<8x8xf32>
    %cst_55 = arith.constant dense<0.000000e+00> : vector<8x8xf32>
    %118 = tpu.matmul %117, %103, %cst_55 {dimension_numbers = #tpu.dot_dimension_numbers<[1], [0], [0], [1], [0, 0, 1, 1], [], []>} : vector<8x8xf32>, vector<8x8xf32>, vector<8x8xf32> -> vector<8x8xf32>
    %119 = tpu.concatenate %67, %84, %101, %118 in 1 : vector<8x8xf32>, vector<8x8xf32>, vector<8x8xf32>, vector<8x8xf32> -> vector<8x32xf32>
    %cst_56 = arith.constant dense<0.000000e+00> : vector<8x32xf32>
    %120 = tpu.matmul %119, %42, %cst_56 {dimension_numbers = #tpu.dot_dimension_numbers<[1], [0], [0], [1], [0, 0, 1, 1], [], []>} : vector<8x32xf32>, vector<32x32xf32>, vector<8x32xf32> -> vector<8x32xf32>
    %121 = vector.broadcast %44 : vector<1x32xf32> to vector<8x32xf32>
    %122 = arith.addf %120, %121 : vector<8x32xf32>
    %123 = arith.addf %4, %122 : vector<8x32xf32>
    %c0_57 = arith.constant 0 : index
    %c0_58 = arith.constant 0 : index
    %c0_59 = arith.constant 0 : index
    %124 = vector.load %arg11[%c0_57, %c0_58, %c0_59] : memref<1x1x32xf32, #tpu.memory_space<vmem>>, vector<1x1x32xf32>
    %125 = vector.shape_cast %124 : vector<1x1x32xf32> to vector<1x32xf32>
    %c0_60 = arith.constant 0 : index
    %c0_61 = arith.constant 0 : index
    %c0_62 = arith.constant 0 : index
    %126 = vector.load %arg12[%c0_60, %c0_61, %c0_62] : memref<1x1x32xf32, #tpu.memory_space<vmem>>, vector<1x1x32xf32>
    %127 = vector.shape_cast %126 : vector<1x1x32xf32> to vector<1x32xf32>
    %cst_63 = arith.constant dense<0.000000e+00> : vector<8xf32>
    %128 = vector.multi_reduction <add>, %123, %cst_63 [1] : vector<8x32xf32> to vector<8xf32>
    %129 = vector.shape_cast %128 : vector<8xf32> to vector<8x1xf32>
    %cst_64 = arith.constant 3.200000e+01 : f32
    %130 = vector.broadcast %cst_64 : f32 to vector<8x1xf32>
    %131 = arith.divf %129, %130 : vector<8x1xf32>
    %132 = vector.broadcast %131 : vector<8x1xf32> to vector<8x32xf32>
    %133 = arith.subf %123, %132 : vector<8x32xf32>
    %134 = arith.mulf %133, %133 : vector<8x32xf32>
    %cst_65 = arith.constant dense<0.000000e+00> : vector<8xf32>
    %135 = vector.multi_reduction <add>, %134, %cst_65 [1] : vector<8x32xf32> to vector<8xf32>
    %136 = vector.shape_cast %135 : vector<8xf32> to vector<8x1xf32>
    %cst_66 = arith.constant 3.200000e+01 : f32
    %137 = vector.broadcast %cst_66 : f32 to vector<8x1xf32>
    %138 = arith.divf %136, %137 : vector<8x1xf32>
    %139 = vector.broadcast %131 : vector<8x1xf32> to vector<8x32xf32>
    %140 = arith.subf %123, %139 : vector<8x32xf32>
    %cst_67 = arith.constant 9.99999974E-6 : f32
    %141 = vector.broadcast %cst_67 : f32 to vector<8x1xf32>
    %142 = arith.addf %138, %141 : vector<8x1xf32>
    %143 = math.rsqrt %142 : vector<8x1xf32>
    %144 = vector.broadcast %143 : vector<8x1xf32> to vector<8x32xf32>
    %145 = arith.mulf %140, %144 : vector<8x32xf32>
    %146 = vector.broadcast %125 : vector<1x32xf32> to vector<8x32xf32>
    %147 = arith.mulf %145, %146 : vector<8x32xf32>
    %148 = vector.broadcast %127 : vector<1x32xf32> to vector<8x32xf32>
    %149 = arith.addf %147, %148 : vector<8x32xf32>
    %c0_68 = arith.constant 0 : index
    %c0_69 = arith.constant 0 : index
    %c0_70 = arith.constant 0 : index
    %150 = vector.load %arg19[%c0_68, %c0_69, %c0_70] : memref<1x32x32xf32, #tpu.memory_space<vmem>>, vector<1x32x32xf32>
    %151 = vector.shape_cast %150 : vector<1x32x32xf32> to vector<32x32xf32>
    %c0_71 = arith.constant 0 : index
    %c0_72 = arith.constant 0 : index
    %c0_73 = arith.constant 0 : index
    %152 = vector.load %arg20[%c0_71, %c0_72, %c0_73] : memref<1x1x32xf32, #tpu.memory_space<vmem>>, vector<1x1x32xf32>
    %153 = vector.shape_cast %152 : vector<1x1x32xf32> to vector<1x32xf32>
    %c0_74 = arith.constant 0 : index
    %c0_75 = arith.constant 0 : index
    %c0_76 = arith.constant 0 : index
    %154 = vector.load %arg21[%c0_74, %c0_75, %c0_76] : memref<1x32x32xf32, #tpu.memory_space<vmem>>, vector<1x32x32xf32>
    %155 = vector.shape_cast %154 : vector<1x32x32xf32> to vector<32x32xf32>
    %c0_77 = arith.constant 0 : index
    %c0_78 = arith.constant 0 : index
    %c0_79 = arith.constant 0 : index
    %156 = vector.load %arg22[%c0_77, %c0_78, %c0_79] : memref<1x1x32xf32, #tpu.memory_space<vmem>>, vector<1x1x32xf32>
    %157 = vector.shape_cast %156 : vector<1x1x32xf32> to vector<1x32xf32>
    %cst_80 = arith.constant dense<0.000000e+00> : vector<8x32xf32>
    %158 = tpu.matmul %149, %151, %cst_80 {dimension_numbers = #tpu.dot_dimension_numbers<[1], [0], [0], [1], [0, 0, 1, 1], [], []>} : vector<8x32xf32>, vector<32x32xf32>, vector<8x32xf32> -> vector<8x32xf32>
    %159 = vector.broadcast %153 : vector<1x32xf32> to vector<8x32xf32>
    %160 = arith.addf %158, %159 : vector<8x32xf32>
    %cst_81 = arith.constant dense<0.000000e+00> : vector<16x32xf32>
    %161 = tpu.matmul %6, %151, %cst_81 {dimension_numbers = #tpu.dot_dimension_numbers<[1], [0], [0], [1], [0, 0, 1, 1], [], []>} : vector<16x32xf32>, vector<32x32xf32>, vector<16x32xf32> -> vector<16x32xf32>
    %162 = vector.broadcast %153 : vector<1x32xf32> to vector<16x32xf32>
    %163 = arith.addf %161, %162 : vector<16x32xf32>
    %164 = vector.extract_strided_slice %160 {offsets = [0, 0], sizes = [8, 8], strides = [1, 1]} : vector<8x32xf32> to vector<8x8xf32>
    %165 = vector.extract_strided_slice %163 {offsets = [0, 0], sizes = [16, 8], strides = [1, 1]} : vector<16x32xf32> to vector<16x8xf32>
    %cst_82 = arith.constant dense<0.000000e+00> : vector<8x16xf32>
    %166 = tpu.matmul %164, %165, %cst_82 {dimension_numbers = #tpu.dot_dimension_numbers<[1], [1], [0], [0], [0, 0, 1, 0], [], []>} : vector<8x8xf32>, vector<16x8xf32>, vector<8x16xf32> -> vector<8x16xf32>
    %cst_83 = arith.constant 0.353553385 : f32
    %167 = vector.broadcast %cst_83 : f32 to vector<8x16xf32>
    %168 = arith.mulf %166, %167 : vector<8x16xf32>
    %169 = arith.addf %168, %10 : vector<8x16xf32>
    %cst_84 = arith.constant dense<0xFF800000> : vector<8xf32>
    %170 = vector.multi_reduction <maximumf>, %169, %cst_84 [1] : vector<8x16xf32> to vector<8xf32>
    %171 = vector.shape_cast %170 : vector<8xf32> to vector<8x1xf32>
    %172 = vector.broadcast %171 : vector<8x1xf32> to vector<8x16xf32>
    %173 = arith.subf %169, %172 : vector<8x16xf32>
    %174 = math.exp %173 : vector<8x16xf32>
    %cst_85 = arith.constant dense<0.000000e+00> : vector<8xf32>
    %175 = vector.multi_reduction <add>, %174, %cst_85 [1] : vector<8x16xf32> to vector<8xf32>
    %176 = vector.shape_cast %175 : vector<8xf32> to vector<8x1xf32>
    %177 = tpu.reciprocal %176 {approx = true} : vector<8x1xf32> -> vector<8x1xf32>
    %178 = vector.broadcast %177 : vector<8x1xf32> to vector<8x16xf32>
    %179 = arith.mulf %174, %178 : vector<8x16xf32>
    %cst_86 = arith.constant dense<0.000000e+00> : vector<8x8xf32>
    %180 = tpu.matmul %179, %165, %cst_86 {dimension_numbers = #tpu.dot_dimension_numbers<[1], [0], [0], [1], [0, 0, 1, 1], [], []>} : vector<8x16xf32>, vector<16x8xf32>, vector<8x8xf32> -> vector<8x8xf32>
    %181 = vector.extract_strided_slice %160 {offsets = [0, 8], sizes = [8, 8], strides = [1, 1]} : vector<8x32xf32> to vector<8x8xf32>
    %182 = vector.extract_strided_slice %163 {offsets = [0, 8], sizes = [16, 8], strides = [1, 1]} : vector<16x32xf32> to vector<16x8xf32>
    %cst_87 = arith.constant dense<0.000000e+00> : vector<8x16xf32>
    %183 = tpu.matmul %181, %182, %cst_87 {dimension_numbers = #tpu.dot_dimension_numbers<[1], [1], [0], [0], [0, 0, 1, 0], [], []>} : vector<8x8xf32>, vector<16x8xf32>, vector<8x16xf32> -> vector<8x16xf32>
    %cst_88 = arith.constant 0.353553385 : f32
    %184 = vector.broadcast %cst_88 : f32 to vector<8x16xf32>
    %185 = arith.mulf %183, %184 : vector<8x16xf32>
    %186 = arith.addf %185, %10 : vector<8x16xf32>
    %cst_89 = arith.constant dense<0xFF800000> : vector<8xf32>
    %187 = vector.multi_reduction <maximumf>, %186, %cst_89 [1] : vector<8x16xf32> to vector<8xf32>
    %188 = vector.shape_cast %187 : vector<8xf32> to vector<8x1xf32>
    %189 = vector.broadcast %188 : vector<8x1xf32> to vector<8x16xf32>
    %190 = arith.subf %186, %189 : vector<8x16xf32>
    %191 = math.exp %190 : vector<8x16xf32>
    %cst_90 = arith.constant dense<0.000000e+00> : vector<8xf32>
    %192 = vector.multi_reduction <add>, %191, %cst_90 [1] : vector<8x16xf32> to vector<8xf32>
    %193 = vector.shape_cast %192 : vector<8xf32> to vector<8x1xf32>
    %194 = tpu.reciprocal %193 {approx = true} : vector<8x1xf32> -> vector<8x1xf32>
    %195 = vector.broadcast %194 : vector<8x1xf32> to vector<8x16xf32>
    %196 = arith.mulf %191, %195 : vector<8x16xf32>
    %cst_91 = arith.constant dense<0.000000e+00> : vector<8x8xf32>
    %197 = tpu.matmul %196, %182, %cst_91 {dimension_numbers = #tpu.dot_dimension_numbers<[1], [0], [0], [1], [0, 0, 1, 1], [], []>} : vector<8x16xf32>, vector<16x8xf32>, vector<8x8xf32> -> vector<8x8xf32>
    %198 = vector.extract_strided_slice %160 {offsets = [0, 16], sizes = [8, 8], strides = [1, 1]} : vector<8x32xf32> to vector<8x8xf32>
    %199 = vector.extract_strided_slice %163 {offsets = [0, 16], sizes = [16, 8], strides = [1, 1]} : vector<16x32xf32> to vector<16x8xf32>
    %cst_92 = arith.constant dense<0.000000e+00> : vector<8x16xf32>
    %200 = tpu.matmul %198, %199, %cst_92 {dimension_numbers = #tpu.dot_dimension_numbers<[1], [1], [0], [0], [0, 0, 1, 0], [], []>} : vector<8x8xf32>, vector<16x8xf32>, vector<8x16xf32> -> vector<8x16xf32>
    %cst_93 = arith.constant 0.353553385 : f32
    %201 = vector.broadcast %cst_93 : f32 to vector<8x16xf32>
    %202 = arith.mulf %200, %201 : vector<8x16xf32>
    %203 = arith.addf %202, %10 : vector<8x16xf32>
    %cst_94 = arith.constant dense<0xFF800000> : vector<8xf32>
    %204 = vector.multi_reduction <maximumf>, %203, %cst_94 [1] : vector<8x16xf32> to vector<8xf32>
    %205 = vector.shape_cast %204 : vector<8xf32> to vector<8x1xf32>
    %206 = vector.broadcast %205 : vector<8x1xf32> to vector<8x16xf32>
    %207 = arith.subf %203, %206 : vector<8x16xf32>
    %208 = math.exp %207 : vector<8x16xf32>
    %cst_95 = arith.constant dense<0.000000e+00> : vector<8xf32>
    %209 = vector.multi_reduction <add>, %208, %cst_95 [1] : vector<8x16xf32> to vector<8xf32>
    %210 = vector.shape_cast %209 : vector<8xf32> to vector<8x1xf32>
    %211 = tpu.reciprocal %210 {approx = true} : vector<8x1xf32> -> vector<8x1xf32>
    %212 = vector.broadcast %211 : vector<8x1xf32> to vector<8x16xf32>
    %213 = arith.mulf %208, %212 : vector<8x16xf32>
    %cst_96 = arith.constant dense<0.000000e+00> : vector<8x8xf32>
    %214 = tpu.matmul %213, %199, %cst_96 {dimension_numbers = #tpu.dot_dimension_numbers<[1], [0], [0], [1], [0, 0, 1, 1], [], []>} : vector<8x16xf32>, vector<16x8xf32>, vector<8x8xf32> -> vector<8x8xf32>
    %215 = vector.extract_strided_slice %160 {offsets = [0, 24], sizes = [8, 8], strides = [1, 1]} : vector<8x32xf32> to vector<8x8xf32>
    %216 = vector.extract_strided_slice %163 {offsets = [0, 24], sizes = [16, 8], strides = [1, 1]} : vector<16x32xf32> to vector<16x8xf32>
    %cst_97 = arith.constant dense<0.000000e+00> : vector<8x16xf32>
    %217 = tpu.matmul %215, %216, %cst_97 {dimension_numbers = #tpu.dot_dimension_numbers<[1], [1], [0], [0], [0, 0, 1, 0], [], []>} : vector<8x8xf32>, vector<16x8xf32>, vector<8x16xf32> -> vector<8x16xf32>
    %cst_98 = arith.constant 0.353553385 : f32
    %218 = vector.broadcast %cst_98 : f32 to vector<8x16xf32>
    %219 = arith.mulf %217, %218 : vector<8x16xf32>
    %220 = arith.addf %219, %10 : vector<8x16xf32>
    %cst_99 = arith.constant dense<0xFF800000> : vector<8xf32>
    %221 = vector.multi_reduction <maximumf>, %220, %cst_99 [1] : vector<8x16xf32> to vector<8xf32>
    %222 = vector.shape_cast %221 : vector<8xf32> to vector<8x1xf32>
    %223 = vector.broadcast %222 : vector<8x1xf32> to vector<8x16xf32>
    %224 = arith.subf %220, %223 : vector<8x16xf32>
    %225 = math.exp %224 : vector<8x16xf32>
    %cst_100 = arith.constant dense<0.000000e+00> : vector<8xf32>
    %226 = vector.multi_reduction <add>, %225, %cst_100 [1] : vector<8x16xf32> to vector<8xf32>
    %227 = vector.shape_cast %226 : vector<8xf32> to vector<8x1xf32>
    %228 = tpu.reciprocal %227 {approx = true} : vector<8x1xf32> -> vector<8x1xf32>
    %229 = vector.broadcast %228 : vector<8x1xf32> to vector<8x16xf32>
    %230 = arith.mulf %225, %229 : vector<8x16xf32>
    %cst_101 = arith.constant dense<0.000000e+00> : vector<8x8xf32>
    %231 = tpu.matmul %230, %216, %cst_101 {dimension_numbers = #tpu.dot_dimension_numbers<[1], [0], [0], [1], [0, 0, 1, 1], [], []>} : vector<8x16xf32>, vector<16x8xf32>, vector<8x8xf32> -> vector<8x8xf32>
    %232 = tpu.concatenate %180, %197, %214, %231 in 1 : vector<8x8xf32>, vector<8x8xf32>, vector<8x8xf32>, vector<8x8xf32> -> vector<8x32xf32>
    %cst_102 = arith.constant dense<0.000000e+00> : vector<8x32xf32>
    %233 = tpu.matmul %232, %155, %cst_102 {dimension_numbers = #tpu.dot_dimension_numbers<[1], [0], [0], [1], [0, 0, 1, 1], [], []>} : vector<8x32xf32>, vector<32x32xf32>, vector<8x32xf32> -> vector<8x32xf32>
    %234 = vector.broadcast %157 : vector<1x32xf32> to vector<8x32xf32>
    %235 = arith.addf %233, %234 : vector<8x32xf32>
    %236 = arith.addf %123, %235 : vector<8x32xf32>
    %c0_103 = arith.constant 0 : index
    %c0_104 = arith.constant 0 : index
    %c0_105 = arith.constant 0 : index
    %237 = vector.load %arg13[%c0_103, %c0_104, %c0_105] : memref<1x1x32xf32, #tpu.memory_space<vmem>>, vector<1x1x32xf32>
    %238 = vector.shape_cast %237 : vector<1x1x32xf32> to vector<1x32xf32>
    %c0_106 = arith.constant 0 : index
    %c0_107 = arith.constant 0 : index
    %c0_108 = arith.constant 0 : index
    %239 = vector.load %arg14[%c0_106, %c0_107, %c0_108] : memref<1x1x32xf32, #tpu.memory_space<vmem>>, vector<1x1x32xf32>
    %240 = vector.shape_cast %239 : vector<1x1x32xf32> to vector<1x32xf32>
    %cst_109 = arith.constant dense<0.000000e+00> : vector<8xf32>
    %241 = vector.multi_reduction <add>, %236, %cst_109 [1] : vector<8x32xf32> to vector<8xf32>
    %242 = vector.shape_cast %241 : vector<8xf32> to vector<8x1xf32>
    %cst_110 = arith.constant 3.200000e+01 : f32
    %243 = vector.broadcast %cst_110 : f32 to vector<8x1xf32>
    %244 = arith.divf %242, %243 : vector<8x1xf32>
    %245 = vector.broadcast %244 : vector<8x1xf32> to vector<8x32xf32>
    %246 = arith.subf %236, %245 : vector<8x32xf32>
    %247 = arith.mulf %246, %246 : vector<8x32xf32>
    %cst_111 = arith.constant dense<0.000000e+00> : vector<8xf32>
    %248 = vector.multi_reduction <add>, %247, %cst_111 [1] : vector<8x32xf32> to vector<8xf32>
    %249 = vector.shape_cast %248 : vector<8xf32> to vector<8x1xf32>
    %cst_112 = arith.constant 3.200000e+01 : f32
    %250 = vector.broadcast %cst_112 : f32 to vector<8x1xf32>
    %251 = arith.divf %249, %250 : vector<8x1xf32>
    %252 = vector.broadcast %244 : vector<8x1xf32> to vector<8x32xf32>
    %253 = arith.subf %236, %252 : vector<8x32xf32>
    %cst_113 = arith.constant 9.99999974E-6 : f32
    %254 = vector.broadcast %cst_113 : f32 to vector<8x1xf32>
    %255 = arith.addf %251, %254 : vector<8x1xf32>
    %256 = math.rsqrt %255 : vector<8x1xf32>
    %257 = vector.broadcast %256 : vector<8x1xf32> to vector<8x32xf32>
    %258 = arith.mulf %253, %257 : vector<8x32xf32>
    %259 = vector.broadcast %238 : vector<1x32xf32> to vector<8x32xf32>
    %260 = arith.mulf %258, %259 : vector<8x32xf32>
    %261 = vector.broadcast %240 : vector<1x32xf32> to vector<8x32xf32>
    %262 = arith.addf %260, %261 : vector<8x32xf32>
    %c0_114 = arith.constant 0 : index
    %c0_115 = arith.constant 0 : index
    %c0_116 = arith.constant 0 : index
    %263 = vector.load %arg23[%c0_114, %c0_115, %c0_116] : memref<1x32x64xf32, #tpu.memory_space<vmem>>, vector<1x32x64xf32>
    %264 = vector.shape_cast %263 : vector<1x32x64xf32> to vector<32x64xf32>
    %cst_117 = arith.constant dense<0.000000e+00> : vector<8x64xf32>
    %265 = tpu.matmul %262, %264, %cst_117 {dimension_numbers = #tpu.dot_dimension_numbers<[1], [0], [0], [1], [0, 0, 1, 1], [], []>} : vector<8x32xf32>, vector<32x64xf32>, vector<8x64xf32> -> vector<8x64xf32>
    %c0_118 = arith.constant 0 : index
    %c0_119 = arith.constant 0 : index
    %c0_120 = arith.constant 0 : index
    %266 = vector.load %arg24[%c0_118, %c0_119, %c0_120] : memref<1x1x64xf32, #tpu.memory_space<vmem>>, vector<1x1x64xf32>
    %267 = vector.shape_cast %266 : vector<1x1x64xf32> to vector<1x64xf32>
    %268 = vector.broadcast %267 : vector<1x64xf32> to vector<8x64xf32>
    %269 = arith.addf %265, %268 : vector<8x64xf32>
    %cst_121 = arith.constant 0.000000e+00 : f32
    %270 = vector.broadcast %cst_121 : f32 to vector<8x64xf32>
    %271 = arith.maximumf %269, %270 : vector<8x64xf32>
    %c0_122 = arith.constant 0 : index
    %c0_123 = arith.constant 0 : index
    %c0_124 = arith.constant 0 : index
    %272 = vector.load %arg25[%c0_122, %c0_123, %c0_124] : memref<1x64x32xf32, #tpu.memory_space<vmem>>, vector<1x64x32xf32>
    %273 = vector.shape_cast %272 : vector<1x64x32xf32> to vector<64x32xf32>
    %cst_125 = arith.constant dense<0.000000e+00> : vector<8x32xf32>
    %274 = tpu.matmul %271, %273, %cst_125 {dimension_numbers = #tpu.dot_dimension_numbers<[1], [0], [0], [1], [0, 0, 1, 1], [], []>} : vector<8x64xf32>, vector<64x32xf32>, vector<8x32xf32> -> vector<8x32xf32>
    %275 = arith.addf %236, %274 : vector<8x32xf32>
    %c0_126 = arith.constant 0 : index
    %c0_127 = arith.constant 0 : index
    %c0_128 = arith.constant 0 : index
    %276 = vector.load %arg26[%c0_126, %c0_127, %c0_128] : memref<1x1x32xf32, #tpu.memory_space<vmem>>, vector<1x1x32xf32>
    %277 = vector.shape_cast %276 : vector<1x1x32xf32> to vector<1x32xf32>
    %278 = vector.broadcast %277 : vector<1x32xf32> to vector<8x32xf32>
    %279 = arith.addf %275, %278 : vector<8x32xf32>
    %c1_i32 = arith.constant 1 : i32
    %280 = arith.cmpi eq, %arg1, %c1_i32 : i32
    %281 = arith.extui %280 : i1 to i32
    %c0_i32_129 = arith.constant 0 : i32
    %282 = arith.cmpi ne, %281, %c0_i32_129 : i32
    scf.if %282 {
      %c0_132 = arith.constant 0 : index
      %c0_133 = arith.constant 0 : index
      %286 = vector.load %arg7[%c0_132, %c0_133] : memref<1x32xf32, #tpu.memory_space<vmem>>, vector<1x32xf32>
      %c0_134 = arith.constant 0 : index
      %c0_135 = arith.constant 0 : index
      %287 = vector.load %arg8[%c0_134, %c0_135] : memref<1x32xf32, #tpu.memory_space<vmem>>, vector<1x32xf32>
      %cst_136 = arith.constant dense<0.000000e+00> : vector<8xf32>
      %288 = vector.multi_reduction <add>, %279, %cst_136 [1] : vector<8x32xf32> to vector<8xf32>
      %289 = vector.shape_cast %288 : vector<8xf32> to vector<8x1xf32>
      %cst_137 = arith.constant 3.200000e+01 : f32
      %290 = vector.broadcast %cst_137 : f32 to vector<8x1xf32>
      %291 = arith.divf %289, %290 : vector<8x1xf32>
      %292 = vector.broadcast %291 : vector<8x1xf32> to vector<8x32xf32>
      %293 = arith.subf %279, %292 : vector<8x32xf32>
      %294 = arith.mulf %293, %293 : vector<8x32xf32>
      %cst_138 = arith.constant dense<0.000000e+00> : vector<8xf32>
      %295 = vector.multi_reduction <add>, %294, %cst_138 [1] : vector<8x32xf32> to vector<8xf32>
      %296 = vector.shape_cast %295 : vector<8xf32> to vector<8x1xf32>
      %cst_139 = arith.constant 3.200000e+01 : f32
      %297 = vector.broadcast %cst_139 : f32 to vector<8x1xf32>
      %298 = arith.divf %296, %297 : vector<8x1xf32>
      %299 = vector.broadcast %291 : vector<8x1xf32> to vector<8x32xf32>
      %300 = arith.subf %279, %299 : vector<8x32xf32>
      %cst_140 = arith.constant 9.99999974E-6 : f32
      %301 = vector.broadcast %cst_140 : f32 to vector<8x1xf32>
      %302 = arith.addf %298, %301 : vector<8x1xf32>
      %303 = math.rsqrt %302 : vector<8x1xf32>
      %304 = vector.broadcast %303 : vector<8x1xf32> to vector<8x32xf32>
      %305 = arith.mulf %300, %304 : vector<8x32xf32>
      %306 = vector.broadcast %286 : vector<1x32xf32> to vector<8x32xf32>
      %307 = arith.mulf %305, %306 : vector<8x32xf32>
      %308 = vector.broadcast %287 : vector<1x32xf32> to vector<8x32xf32>
      %309 = arith.addf %307, %308 : vector<8x32xf32>
      %c0_141 = arith.constant 0 : index
      %c0_142 = arith.constant 0 : index
      %c0_143 = arith.constant 0 : index
      %310 = vector.load %arg27[%c0_141, %c0_142, %c0_143] : memref<1x8x32xf32, #tpu.memory_space<vmem>>, vector<1x8x32xf32>
      %311 = vector.shape_cast %310 : vector<1x8x32xf32> to vector<8x32xf32>
      %312 = vector.shape_cast %309 : vector<8x32xf32> to vector<1x8x32xf32>
      tpu.vector_store %arg27[%c0_141, %c0_142, %c0_143], %312 {strides = array<i32>} : memref<1x8x32xf32, #tpu.memory_space<vmem>>, vector<1x8x32xf32>,
    } else {
    }
    %c1_i32_130 = arith.constant 1 : i32
    %283 = arith.cmpi slt, %arg1, %c1_i32_130 : i32
    %284 = arith.extui %283 : i1 to i32
    %c0_i32_131 = arith.constant 0 : i32
    %285 = arith.cmpi ne, %284, %c0_i32_131 : i32
    scf.if %285 {
      %c0_132 = arith.constant 0 : index
      %c0_133 = arith.constant 0 : index
      %c0_134 = arith.constant 0 : index
      %286 = vector.load %arg27[%c0_132, %c0_133, %c0_134] : memref<1x8x32xf32, #tpu.memory_space<vmem>>, vector<1x8x32xf32>
      %287 = vector.shape_cast %286 : vector<1x8x32xf32> to vector<8x32xf32>
      %288 = vector.shape_cast %279 : vector<8x32xf32> to vector<1x8x32xf32>
      tpu.vector_store %arg27[%c0_132, %c0_133, %c0_134], %288 {strides = array<i32>} : memref<1x8x32xf32, #tpu.memory_space<vmem>>, vector<1x8x32xf32>,
    } else {
    }
    return
  }
  func.func @transform_0(%arg0: i32, %arg1: i32) -> (i32, i32, i32) {
    %c0_i32 = arith.constant 0 : i32
    %c0_i32_0 = arith.constant 0 : i32
    %c0_i32_1 = arith.constant 0 : i32
    return %arg0, %c0_i32, %c0_i32_0 : i32, i32, i32
  }
  func.func @transform_1(%arg0: i32, %arg1: i32) -> (i32, i32, i32) {
    %c0_i32 = arith.constant 0 : i32
    %c0_i32_0 = arith.constant 0 : i32
    %c0_i32_1 = arith.constant 0 : i32
    return %arg0, %c0_i32, %c0_i32_0 : i32, i32, i32
  }
  func.func @transform_2(%arg0: i32, %arg1: i32) -> (i32, i32, i32) {
    %c0_i32 = arith.constant 0 : i32
    %c0_i32_0 = arith.constant 0 : i32
    %c0_i32_1 = arith.constant 0 : i32
    %c0_i32_2 = arith.constant 0 : i32
    return %c0_i32, %c0_i32_0, %c0_i32_1 : i32, i32, i32
  }
  func.func @transform_3(%arg0: i32, %arg1: i32) -> (i32, i32, i32) {
    %c0_i32 = arith.constant 0 : i32
    %c0_i32_0 = arith.constant 0 : i32
    %c0_i32_1 = arith.constant 0 : i32
    return %arg0, %c0_i32, %c0_i32_0 : i32, i32, i32
  }
  func.func @transform_4(%arg0: i32, %arg1: i32) -> (i32, i32, i32) {
    %c0_i32 = arith.constant 0 : i32
    %c0_i32_0 = arith.constant 0 : i32
    %c0_i32_1 = arith.constant 0 : i32
    return %arg0, %c0_i32, %c0_i32_0 : i32, i32, i32
  }
  func.func @transform_5(%arg0: i32, %arg1: i32) -> (i32, i32) {
    %c0_i32 = arith.constant 0 : i32
    %c0_i32_0 = arith.constant 0 : i32
    %c0_i32_1 = arith.constant 0 : i32
    return %c0_i32, %c0_i32_0 : i32, i32
  }
  func.func @transform_6(%arg0: i32, %arg1: i32) -> (i32, i32) {
    %c0_i32 = arith.constant 0 : i32
    %c0_i32_0 = arith.constant 0 : i32
    %c0_i32_1 = arith.constant 0 : i32
    return %c0_i32, %c0_i32_0 : i32, i32
  }
  func.func @transform_7(%arg0: i32, %arg1: i32) -> (i32, i32, i32) {
    %c0_i32 = arith.constant 0 : i32
    %c0_i32_0 = arith.constant 0 : i32
    %c0_i32_1 = arith.constant 0 : i32
    return %arg1, %c0_i32, %c0_i32_0 : i32, i32, i32
  }
  func.func @transform_8(%arg0: i32, %arg1: i32) -> (i32, i32, i32) {
    %c0_i32 = arith.constant 0 : i32
    %c0_i32_0 = arith.constant 0 : i32
    %c0_i32_1 = arith.constant 0 : i32
    return %arg1, %c0_i32, %c0_i32_0 : i32, i32, i32
  }
  func.func @transform_9(%arg0: i32, %arg1: i32) -> (i32, i32, i32) {
    %c0_i32 = arith.constant 0 : i32
    %c0_i32_0 = arith.constant 0 : i32
    %c0_i32_1 = arith.constant 0 : i32
    return %arg1, %c0_i32, %c0_i32_0 : i32, i32, i32
  }
  func.func @transform_10(%arg0: i32, %arg1: i32) -> (i32, i32, i32) {
    %c0_i32 = arith.constant 0 : i32
    %c0_i32_0 = arith.constant 0 : i32
    %c0_i32_1 = arith.constant 0 : i32
    return %arg1, %c0_i32, %c0_i32_0 : i32, i32, i32
  }
  func.func @transform_11(%arg0: i32, %arg1: i32) -> (i32, i32, i32) {
    %c0_i32 = arith.constant 0 : i32
    %c0_i32_0 = arith.constant 0 : i32
    %c0_i32_1 = arith.constant 0 : i32
    return %arg1, %c0_i32, %c0_i32_0 : i32, i32, i32
  }
  func.func @transform_12(%arg0: i32, %arg1: i32) -> (i32, i32, i32) {
    %c0_i32 = arith.constant 0 : i32
    %c0_i32_0 = arith.constant 0 : i32
    %c0_i32_1 = arith.constant 0 : i32
    return %arg1, %c0_i32, %c0_i32_0 : i32, i32, i32
  }
  func.func @transform_13(%arg0: i32, %arg1: i32) -> (i32, i32, i32) {
    %c0_i32 = arith.constant 0 : i32
    %c0_i32_0 = arith.constant 0 : i32
    %c0_i32_1 = arith.constant 0 : i32
    return %arg1, %c0_i32, %c0_i32_0 : i32, i32, i32
  }
  func.func @transform_14(%arg0: i32, %arg1: i32) -> (i32, i32, i32) {
    %c0_i32 = arith.constant 0 : i32
    %c0_i32_0 = arith.constant 0 : i32
    %c0_i32_1 = arith.constant 0 : i32
    return %arg1, %c0_i32, %c0_i32_0 : i32, i32, i32
  }
  func.func @transform_15(%arg0: i32, %arg1: i32) -> (i32, i32, i32) {
    %c0_i32 = arith.constant 0 : i32
    %c0_i32_0 = arith.constant 0 : i32
    %c0_i32_1 = arith.constant 0 : i32
    return %arg1, %c0_i32, %c0_i32_0 : i32, i32, i32
  }
  func.func @transform_16(%arg0: i32, %arg1: i32) -> (i32, i32, i32) {
    %c0_i32 = arith.constant 0 : i32
    %c0_i32_0 = arith.constant 0 : i32
    %c0_i32_1 = arith.constant 0 : i32
    return %arg1, %c0_i32, %c0_i32_0 : i32, i32, i32
  }
  func.func @transform_17(%arg0: i32, %arg1: i32) -> (i32, i32, i32) {
    %c0_i32 = arith.constant 0 : i32
    %c0_i32_0 = arith.constant 0 : i32
    %c0_i32_1 = arith.constant 0 : i32
    return %arg1, %c0_i32, %c0_i32_0 : i32, i32, i32
  }
  func.func @transform_18(%arg0: i32, %arg1: i32) -> (i32, i32, i32) {
    %c0_i32 = arith.constant 0 : i32
    %c0_i32_0 = arith.constant 0 : i32
    %c0_i32_1 = arith.constant 0 : i32
    return %arg1, %c0_i32, %c0_i32_0 : i32, i32, i32
  }
  func.func @transform_19(%arg0: i32, %arg1: i32) -> (i32, i32, i32) {
    %c0_i32 = arith.constant 0 : i32
    %c0_i32_0 = arith.constant 0 : i32
    %c0_i32_1 = arith.constant 0 : i32
    return %arg1, %c0_i32, %c0_i32_0 : i32, i32, i32
  }
  func.func @transform_20(%arg0: i32, %arg1: i32) -> (i32, i32, i32) {
    %c0_i32 = arith.constant 0 : i32
    %c0_i32_0 = arith.constant 0 : i32
    %c0_i32_1 = arith.constant 0 : i32
    return %arg1, %c0_i32, %c0_i32_0 : i32, i32, i32
  }
  func.func @transform_21(%arg0: i32, %arg1: i32) -> (i32, i32, i32) {
    %c0_i32 = arith.constant 0 : i32
    %c0_i32_0 = arith.constant 0 : i32
    %c0_i32_1 = arith.constant 0 : i32
    return %arg1, %c0_i32, %c0_i32_0 : i32, i32, i32
  }
  func.func @transform_22(%arg0: i32, %arg1: i32) -> (i32, i32, i32) {
    %c0_i32 = arith.constant 0 : i32
    %c0_i32_0 = arith.constant 0 : i32
    %c0_i32_1 = arith.constant 0 : i32
    return %arg1, %c0_i32, %c0_i32_0 : i32, i32, i32
  }
  func.func @transform_23(%arg0: i32, %arg1: i32) -> (i32, i32, i32) {
    %c0_i32 = arith.constant 0 : i32
    %c0_i32_0 = arith.constant 0 : i32
    %c0_i32_1 = arith.constant 0 : i32
    return %arg1, %c0_i32, %c0_i32_0 : i32, i32, i32
  }
  func.func @transform_24(%arg0: i32, %arg1: i32) -> (i32, i32, i32) {
    %c0_i32 = arith.constant 0 : i32
    %c0_i32_0 = arith.constant 0 : i32
    %c0_i32_1 = arith.constant 0 : i32
    return %arg1, %c0_i32, %c0_i32_0 : i32, i32, i32
  }
  func.func @transform_25(%arg0: i32, %arg1: i32) -> (i32, i32, i32) {
    %c0_i32 = arith.constant 0 : i32
    %c0_i32_0 = arith.constant 0 : i32
    %c0_i32_1 = arith.constant 0 : i32
    return %arg0, %c0_i32, %c0_i32_0 : i32, i32, i32
  }
}

</mosaic_0001>

<bundles_post_ra>
// kernel: decoder_forward.1
= control target key start
LH: loop header
LB: loop body
LE: loop exit
PB: predicated region body
PF: predicated region fallthrough
CT: control target
= control target key end

     0   :  { %s5570_s0 = inlined_call_operand.vmem [shape: f32[2,8,32], index: 0, kind: input, shape index: {}]   ;;  %s5571_s1 = inlined_call_operand.vmem [shape: f32[2,16,32], index: 1, kind: input, shape index: {}]   ;;  %s5572_s2 = inlined_call_operand.vmem [shape: f32[1,8,32], index: 2, kind: input, shape index: {}]   ;;  %s5573_s3 = inlined_call_operand.vmem [shape: f32[2,8,8], index: 3, kind: input, shape index: {}]   ;;  %s5574_s4 = inlined_call_operand.vmem [shape: f32[2,8,16], index: 4, kind: input, shape index: {}]   ;;  %s5575_s5 = inlined_call_operand.vmem [shape: f32[1,32], index: 5, kind: input, shape index: {}]   ;;  %s5576_s6 = inlined_call_operand.vmem [shape: f32[1,32], index: 6, kind: input, shape index: {}]   ;;  %s5577_s7 = inlined_call_operand.vmem [shape: f32[2,1,32], index: 7, kind: input, shape index: {}]   ;;  %s5578_s8 = inlined_call_operand.vmem [shape: f32[2,1,32], index: 8, kind: input, shape index: {}]   ;;  %s5579_s9 = inlined_call_operand.vmem [shape: f32[2,1,32], index: 9, kind: input, shape index: {}]   ;;  %s5580_s10 = inlined_call_operand.vmem [shape: f32[2,1,32], index: 10, kind: input, shape index: {}]   ;;  %s5581_s11 = inlined_call_operand.vmem [shape: f32[2,1,32], index: 11, kind: input, shape index: {}]   ;;  %s5582_s12 = inlined_call_operand.vmem [shape: f32[2,1,32], index: 12, kind: input, shape index: {}]   ;;  %s5583_s13 = inlined_call_operand.vmem [shape: f32[2,32,32], index: 13, kind: input, shape index: {}]   ;;  %s5584_s14 = inlined_call_operand.vmem [shape: f32[2,1,32], index: 14, kind: input, shape index: {}]   ;;  %s5585_s15 = inlined_call_operand.vmem [shape: f32[2,32,32], index: 15, kind: input, shape index: {}]   ;;  %s5586_s16 = inlined_call_operand.vmem [shape: f32[2,1,32], index: 16, kind: input, shape index: {}]   ;;  %s5587_s17 = inlined_call_operand.vmem [shape: f32[2,32,32], index: 17, kind: input, shape index: {}]   ;;  %s5588_s18 = inlined_call_operand.hbm [shape: f32[2,1,32], index: 18, kind: input, shape index: {}]   ;;  %s5589_s19 = inlined_call_operand.hbm [shape: f32[2,32,32], index: 19, kind: input, shape index: {}]   ;;  %s5590_s20 = inlined_call_operand.hbm [shape: f32[2,1,32], index: 20, kind: input, shape index: {}]   ;;  %s5591_s21 = inlined_call_operand.hbm [shape: f32[2,32,64], index: 21, kind: input, shape index: {}]   ;;  %s5592_s22 = inlined_call_operand.hbm [shape: f32[2,1,64], index: 22, kind: input, shape index: {}]   ;;  %s5593_s23 = inlined_call_operand.vmem [shape: f32[2,64,32], index: 23, kind: input, shape index: {}]   ;;  %s5594_s24 = inlined_call_operand.hbm [shape: f32[2,1,32], index: 24, kind: input, shape index: {}]   ;;  %s5595_s25 = inlined_call_operand.hbm [shape: f32[2,8,32], index: 25, kind: output, shape index: {}]  }
   0x1   :  { %5622 = sst [smem:[#allocation35_spill]] %s5570_s0 }
   0x2   :  { %5623 = sst [smem:[#allocation36_spill]] %s5571_s1 }
   0x3   :  { %5624 = sst [smem:[#allocation37_spill]] %s5572_s2 }
   0x4   :  { %5625 = sst [smem:[#allocation38_spill]] %s5573_s3 }
   0x5   :  { %5626 = sst [smem:[#allocation39_spill]] %s5574_s4 }
   0x6   :  { %5627 = sst [smem:[#allocation40_spill]] %s5575_s5 }
   0x7   :  { %5628 = sst [smem:[#allocation41_spill]] %s5576_s6 }
   0x8   :  { %5629 = sst [smem:[#allocation42_spill]] %s5577_s7 }
   0x9   :  { %5630 = sst [smem:[#allocation43_spill]] %s5578_s8 }
   0xa   :  { %5631 = sst [smem:[#allocation44_spill]] %s5579_s9 }
   0xb   :  { %5632 = sst [smem:[#allocation45_spill]] %s5581_s11 }
   0xc   :  { %5633 = sst [smem:[#allocation46_spill]] %s5582_s12 }
   0xd   :  { %5634 = sst [smem:[#allocation47_spill]] %s5583_s13 }
   0xe   :  { %5635 = sst [smem:[#allocation48_spill]] %s5584_s14 }
   0xf   :  { %5636 = sst [smem:[#allocation49_spill]] %s5585_s15 }
  0x10   :  { %5637 = sst [smem:[#allocation50_spill]] %s5586_s16 }
  0x11   :  { %5638 = sst [smem:[#allocation51_spill]] %s5587_s17 }
  0x12   :  { %5639 = sst [smem:[#allocation52_spill]] %s5588_s18 }
  0x13   :  { %5640 = sst [smem:[#allocation53_spill]] %s5589_s19 }
  0x14   :  { %5641 = sst [smem:[#allocation54_spill]] %s5590_s20 }
  0x15   :  { %5642 = sst [smem:[#allocation55_spill]] %s5591_s21 }
  0x16   :  { %5643 = sst [smem:[#allocation56_spill]] %s5592_s22 }
  0x17   :  { %5644 = sst [smem:[#allocation57_spill]] %s5593_s23 }
  0x18   :  { %5645 = sst [smem:[#allocation58_spill]] %s5594_s24 }
  0x19   :  { %5646 = sst [smem:[#allocation59_spill]] %s5595_s25 }
  0x1a   :  { %30 = vsyncpa [#allocation3], 0 }
  0x1b   :  { %32 = vsyncpa [#allocation3 + $0x1], 0 }
  0x1c   :  { %33 = vsyncpa [#allocation6], 0 }
  0x1d   :  { %35 = vsyncpa [#allocation6 + $0x1], 0 }
  0x1e   :  { %36 = vsyncpa [#allocation9], 0 }
  0x1f   :  { %38 = vsyncpa [#allocation9 + $0x1], 0 }
  0x20   :  { %39 = vsyncpa [#allocation12], 0 }
  0x21   :  { %41 = vsyncpa [#allocation12 + $0x1], 0 }
  0x22   :  { %42 = vsyncpa [#allocation4], 0 }
  0x23   :  { %44 = vsyncpa [#allocation4 + $0x1], 0  ;;  %s4767_s29 = smov 0   ;;  %s4769_s2 = smov 0  }
  0x24   :  { %s4771_s6 = smov 0   ;;  %s4773_s30 = smov 0  }
  0x25   :  { %s4775_s7 = smov 0   ;;  %s4777_s3 = smov 0  }
  0x26   :  { %s4779_s26 = smov 0   ;;  %s4781_s1 = smov 0  }
  0x27   :  { %s4783_s8 = smov 0   ;;  %s4785_s27 = smov 0  }
  0x28   :  { %s4787_s4 = smov 0  }
  0x29 LB: > { %5647 = sst [smem:[#allocation19_spill]] %s4577_s29  ;;  %s4821_s28 = sadd.s32 4294967295, %s4617_s4   ;;  %s4617_s4 = sphi %s4787_s4, %s50_s4   ;;  %s4613_s27 = sphi %s4785_s27, %s5749_s27   ;;  %s4609_s8 = sphi %s4783_s8, %s5748_s8   ;;  %s4605_s1 = sphi %s4781_s1, %s5747_s1   ;;  %s4601_s26 = sphi %s4779_s26, %s5746_s26   ;;  %s4597_s3 = sphi %s4777_s3, %s5745_s3   ;;  %s4593_s7 = sphi %s4775_s7, %s5744_s7   ;;  %s4589_s30 = sphi %s4773_s30, %s5743_s30   ;;  %s4585_s6 = sphi %s4771_s6, %s5742_s6   ;;  %s4581_s2 = sphi %s4769_s2, %s5741_s2   ;;  %s4577_s29 = sphi %s4767_s29, %s5740_s29  }
  0x2a   : > { %5648 = sst [smem:[#allocation20_spill]] %s4581_s2  ;;  %s3677_s9 = sadd.s32 4294967294, %s4617_s4  }
  0x2b   : > { %5649 = sst [smem:[#allocation21_spill]] %s4585_s6  ;;  %s59_s5 = sadd.s32 1, %s4609_s8 }
  0x2c   : > { %5650 = sst [smem:[#allocation22_spill]] %s4593_s7  ;;  %s62_s0 = sadd.s32 1, %s4613_s27 }
  0x2d   : > { %5651 = sst [smem:[#allocation23_spill]] %s4597_s3  ;;  %p60_p0 = scmp.ge.s32.totalorder %s59_s5, 2 }
  0x2e   : > { %5652 = sst [smem:[#allocation24_spill]] %s4605_s1  ;;  %s522_s25 = sadd.s32 1, %s4597_s3 }
  0x2f   : > { %5653 = sst [smem:[#allocation25_spill]] %s4609_s8  ;;  %p529_p1 = scmp.ne.s32.totalorder %s4597_s3, %s4593_s7 }
  0x30   : > { %5654 = sst [smem:[#allocation26_spill]] %s4613_s27  ;;  %p530_p2 = scmp.eq.s32.totalorder %s4617_s4, 0 }
  0x31   : > { %5655 = sst [smem:[#allocation27_spill]] %s4617_s4  ;;  %s5751_s5 = smov (%p60_p0, %s59_s5), 0 }
  0x32   : > { %5656 = sst [smem:[#allocation28_spill]] %s5751_s5  ;;  %s5753_s0 = smov (!%p60_p0, %s62_s0), %s4613_s27 }
  0x33   : > { %s519_s23 = ssub.s32 %s4609_s8, %s5751_s5  ;;  %p4835_p3 = por %p530_p2, %p529_p1 }
  0x34   : > { %p64_p4 = scmp.ge.s32.totalorder %s5753_s0, 2  ;;  %p520_p5 = scmp.eq.s32.totalorder %s519_s23, 0 }
  0x35   : > { %p535_p6 = scmp.ne.s32.totalorder %s4593_s7, %s4589_s30  ;;  %p536_p7 = scmp.eq.s32.totalorder %s4821_s28, 0 }
  0x36   : > { %s5755_s0 = smov (%p64_p4, %s5753_s0), 0  ;;  %s704_s13 = sadd.s32 1, %s4585_s6 }
  0x37   : > { %5658 = sst [smem:[#allocation29_spill]] %s5755_s0  ;;  %p4846_p8 = por %p536_p7, %p535_p6 }
  0x38   : > { %s4844_s16 = scalar_select %p520_p5, %s4597_s3, %s522_s25  }
  0x39   : > { %s5660_s5 = scalar_select %p4846_p8, 1, 0 }
  0x3a   : > { %5659 = sst [smem:[#allocation30_spill]] %s4844_s16  ;;  %s701_s15 = ssub.s32 %s4613_s27, %s5755_s0 }
  0x3b   : > { %p702_p9 = scmp.eq.s32.totalorder %s701_s15, 0  ;;  %p714_p10 = scmp.ne.s32.totalorder %s4585_s6, %s4581_s2 }
  0x3c   : > { %p715_p11 = scmp.eq.s32.totalorder %s4821_s28, 3  ;;  %p720_p13 = scmp.ne.s32.totalorder %s4581_s2, %s4577_s29 }
  0x3d   : > { %s4857_s23 = scalar_select %p702_p9, %s4585_s6, %s704_s13  }
  0x3e   : > { %p4859_p12 = por %p715_p11, %p714_p10  ;;  %p721_p0 = scmp.eq.s32.totalorder %s3677_s9, 3 }
  0x3f   : > { %5661 = sst [smem:[#allocation31_spill]] %s4857_s23  ;;  %p4147_p1 = scmp.lt.s32.totalorder %s4617_s4, 4 }
  0x40   : > { %s5662_s30 = scalar_select %p4859_p12, 1, 0 }
  0x41   : > { %s4867_s25 = sand.u32 1, %s4597_s3   ;;  %p4869_p2 = por %p721_p0, %p720_p13 }
  0x42   : > { %5663 = sst [smem:[#allocation32_spill]] %s5662_s30  ;;  %p4876_p4 = pnand %p4147_p1, %p4835_p3 }
  0x43   : > { %s5664_s15 = scalar_select %p4869_p2, 1, 0 }
  0x44   : > { %s5666_s13 = scalar_select %p4876_p4, 1, 0 }
  0x45   : > { %5665 = sst [smem:[#allocation33_spill]] %s5664_s15  ;;  %s5604_s27 = sshll.u32 %s4867_s25, 5 }
  0x46   : > { %s5605_s16 = sshll.u32 %s4609_s8, 9  ;;  %s5667_s19 = sld [smem:[#allocation53_spill]] }
  0x47   : > { %s872_s0 = scalar_lea.vmem [#allocation5], %s5604_s27  ;;  %s5668_s6 = sand.u32 1, %s4617_s4  }
  0x48   : > { %s879_s17 = sshll.u32 %s872_s0, 4  ;;  %s4896_s15 = scalar_lea.sflag [#allocation6], %s5668_s6  ;;  %s4891_s17 = int_to_ptr.vmem [resolvable:$true] %s879_s17 }
  0x49   : > { %p4902_p6 = pneg %p4876_p4 }
  0x4c   : > { %s4887_s3 = scalar_lea.hbm %s5667_s19, %s5605_s16  ;;  %s4308_s0 = scalar_lea.hbm %s5667_s19, 1024 }
  0x4d   : > { %s4303_s29 = scalar_lea.hbm %s4887_s3, 512  ;;  %p4309_p10 = scmp.lt.u32.totalorder %s4887_s3, %s5667_s19 }
  0x4e   : > { %p4304_p5 = scmp.ne.s32.totalorder %s4887_s3, %s4303_s29  ;;  %p4310_p11 = scmp.lt.u32.totalorder %s4308_s0, %s4303_s29 }
  0x4f   : > { %p4312_p0 = scmp.lt.u32.totalorder %s4303_s29, %s4887_s3 }
  0x50   : > { %p4306_p7 = pnand %p4902_p6, %p4304_p5  ;;  %p4311_p13 = por %p4310_p11, %p4309_p10 }
  0x52   : > { %p4307_p9 = pneg %p4306_p7  ;;  %p4313_p1 = por %p4312_p0, %p4311_p13 }
  0x54   : > { %p4314_p3 = pnand %p4313_p1, %p4307_p9 }
  0x56   : > { %4317 = shalt.err (!%p4314_p3)
}
  0x57   : > { %s4318_s6 = scalar_lea.vmem %s4891_s17, 512  ;;  %s4619_s27 = smov [#allocation5]  }
  0x58   : > { %p4319_p5 = scmp.ne.s32.totalorder %s4891_s17, %s4318_s6  ;;  %s4323_s9 = sshll.u32 %s4619_s27, 4  ;;  %s4324_s9 = int_to_ptr.vmem [resolvable:$false] %s4323_s9 }
  0x59   : > { %s4325_s16 = scalar_lea.vmem %s4324_s9, 1024  ;;  %p4326_p12 = scmp.lt.s32.totalorder %s4891_s17, %s4324_s9 }
  0x5a   : > { %p4321_p7 = pnand %p4319_p5, %p4902_p6  ;;  %p4327_p8 = scmp.lt.s32.totalorder %s4325_s16, %s4318_s6 }
  0x5c   : > { %p4322_p2 = pneg %p4321_p7  ;;  %p4328_p10 = por %p4327_p8, %p4326_p12 }
  0x5e   : > { %p4329_p11 = pnand %p4328_p10, %p4322_p2 }
  0x60   : > { %4332 = shalt.err (!%p4329_p11)
}
  0x61   : > { %s5610_s29 = smov 128   ;;  %s5611_s30 = smov 8  }
  0x62   : > { %4130 = dma.hbm_to_vmem [thread:$0]  (!%p4876_p4), %s4887_s3, 512, %s4891_s17, %s4896_s15, %s5610_s29, %s5610_s29, %s5611_s30  }
  0x63   : > { %p967_p8 = scmp.lt.s32.totalorder %s4617_s4, 5  ;;  %s5670_s0 = sshll.u32 %s4609_s8, 9 }
  0x64   : > { %s5671_s21 = sld [smem:[#allocation55_spill]]  ;;  %p5672_p12 = scmp.ge.s32.totalorder %s4617_s4, 1 }
  0x65   : > { %s5674_s19 = sshll.u32 %s4867_s25, 5  ;;  %s5675_s3 = sand.u32 1, %s4617_s4  }
  0x66   : > { %p4939_p2 = pnand %p5672_p12, %p967_p8  ;;  %s910_s14 = scalar_lea.vmem [#allocation8], %s5674_s19 }
  0x67   : > { %s917_s12 = sshll.u32 %s910_s14, 4  ;;  %s4949_s17 = scalar_lea.sflag [#allocation9], %s5675_s3  ;;  %s4945_s12 = int_to_ptr.vmem [resolvable:$true] %s917_s12 }
  0x68   : > { %s5673_s16 = scalar_select %p4939_p2, 1, 0 }
  0x6a   : > { %s4935_s9 = scalar_lea.hbm %s5671_s21, %s5670_s0  ;;  %s4338_s29 = scalar_lea.hbm %s5671_s21, 1024 }
  0x6b   : > { %s4333_s6 = scalar_lea.hbm %s4935_s9, 512  ;;  %p4339_p0 = scmp.lt.u32.totalorder %s4935_s9, %s5671_s21 }
  0x6c   : > { %p4334_p3 = scmp.ne.s32.totalorder %s4935_s9, %s4333_s6  ;;  %p4340_p1 = scmp.lt.u32.totalorder %s4338_s29, %s4333_s6 }
  0x6d   : > { %p4342_p7 = scmp.lt.u32.totalorder %s4333_s6, %s4935_s9 }
  0x6e   : > { %p4336_p9 = pnand %p4334_p3, %p4902_p6  ;;  %p4341_p5 = por %p4340_p1, %p4339_p0 }
  0x70   : > { %p4337_p13 = pneg %p4336_p9  ;;  %p4343_p10 = por %p4342_p7, %p4341_p5 }
  0x72   : > { %p4344_p11 = pnand %p4343_p10, %p4337_p13 }
  0x74   : > { %4347 = shalt.err (!%p4344_p11)
}
  0x75   : > { %s4348_s14 = scalar_lea.vmem %s4945_s12, 512  ;;  %s4622_s19 = smov [#allocation8]  }
  0x76   : > { %p4349_p8 = scmp.ne.s32.totalorder %s4945_s12, %s4348_s14  ;;  %s4353_s3 = sshll.u32 %s4622_s19, 4  ;;  %s4354_s3 = int_to_ptr.vmem [resolvable:$false] %s4353_s3 }
  0x77   : > { %s4355_s11 = scalar_lea.vmem %s4354_s3, 1024  ;;  %p4356_p9 = scmp.lt.s32.totalorder %s4945_s12, %s4354_s3 }
  0x78   : > { %p4351_p12 = pnand %p4349_p8, %p4902_p6  ;;  %p4357_p2 = scmp.lt.s32.totalorder %s4355_s11, %s4348_s14 }
  0x7a   : > { %p4352_p3 = pneg %p4351_p12  ;;  %p4358_p0 = por %p4357_p2, %p4356_p9 }
  0x7c   : > { %p4359_p1 = pnand %p4358_p0, %p4352_p3 }
  0x7e   : > { %4362 = shalt.err (!%p4359_p1)
}
  0x7f   : > { %s5676_s29 = smov 8   ;;  %s5677_s30 = smov 128  }
  0x80   : > { %4136 = dma.hbm_to_vmem [thread:$0]  (!%p4876_p4), %s4935_s9, 512, %s4945_s12, %s4949_s17, %s5677_s30, %s5677_s30, %s5676_s29  }
  0x81   : > { %s4977_s6 = sshll.u32 %s4609_s8, 4  ;;  %s5678_s18 = sld [smem:[#allocation52_spill]] }
  0x82   : > { %s854_s19 = scalar_lea.vmem [#allocation2], %s4867_s25  ;;  %s852_s11 = scalar_lea.sflag [#allocation3], %s4867_s25 }
  0x83   : > { %s861_s3 = sshll.u32 %s854_s19, 4  ;;  %s862_s3 = int_to_ptr.vmem [resolvable:$true] %s861_s3 }
  0x87   : > { %s4983_s14 = scalar_lea.hbm %s5678_s18, %s4977_s6  ;;  %s4368_s29 = scalar_lea.hbm %s5678_s18, 32 }
  0x88   : > { %s4363_s21 = scalar_lea.hbm %s4983_s14, 16  ;;  %p4369_p7 = scmp.lt.u32.totalorder %s4983_s14, %s5678_s18 }
  0x89   : > { %p4364_p2 = scmp.ne.s32.totalorder %s4983_s14, %s4363_s21  ;;  %p4370_p10 = scmp.lt.u32.totalorder %s4368_s29, %s4363_s21 }
  0x8a   : > { %p4372_p8 = scmp.lt.u32.totalorder %s4363_s21, %s4983_s14 }
  0x8b   : > { %p4366_p13 = pnand %p4364_p2, %p4902_p6  ;;  %p4371_p11 = por %p4370_p10, %p4369_p7 }
  0x8d   : > { %p4367_p5 = pneg %p4366_p13  ;;  %p4373_p12 = por %p4372_p8, %p4371_p11 }
  0x8f   : > { %p4374_p3 = pnand %p4373_p12, %p4367_p5 }
  0x91   : > { %4377 = shalt.err (!%p4374_p3)
}
  0x92   : > { %s4378_s27 = scalar_lea.vmem %s862_s3, 16  ;;  %s4623_s19 = smov [#allocation2]  }
  0x93   : > { %p4379_p9 = scmp.ne.s32.totalorder %s862_s3, %s4378_s27  ;;  %s4383_s8 = sshll.u32 %s4623_s19, 4  ;;  %s4384_s8 = int_to_ptr.vmem [resolvable:$false] %s4383_s8 }
  0x94   : > { %s4385_s12 = scalar_lea.vmem %s4384_s8, 32  ;;  %p4386_p2 = scmp.lt.s32.totalorder %s862_s3, %s4384_s8 }
  0x95   : > { %p4381_p0 = pnand %p4379_p9, %p4902_p6  ;;  %p4387_p13 = scmp.lt.s32.totalorder %s4385_s12, %s4378_s27 }
  0x97   : > { %p4382_p1 = pneg %p4381_p0  ;;  %p4388_p4 = por %p4387_p13, %p4386_p2 }
  0x99   : > { %p4389_p7 = pnand %p4388_p4, %p4382_p1 }
  0x9b   : > { %4392 = shalt.err (!%p4389_p7)
}
  0x9c   : > { %p5679_p10 = scmp.ne.s32.totalorder %s5666_s13, 0  ;;  %s5680_s20 = sld [smem:[#allocation54_spill]] }
  0x9d   : > { %s892_s8 = scalar_lea.vmem [#allocation7], %s4867_s25 }
  0x9e   : > { %4127 = dma.hbm_to_vmem [thread:$0]  (!%p5679_p10), %s4983_s14, 16, %s862_s3, %s852_s11  }
  0x9f   : > { %s899_s30 = sshll.u32 %s892_s8, 4  ;;  %s900_s30 = int_to_ptr.vmem [resolvable:$true] %s899_s30 }
  0xa2   : > { %s5008_s29 = scalar_lea.hbm %s5680_s20, %s4977_s6  ;;  %s4398_s14 = scalar_lea.hbm %s5680_s20, 32 }
  0xa3   : > { %s4393_s0 = scalar_lea.hbm %s5008_s29, 16  ;;  %p4399_p8 = scmp.lt.u32.totalorder %s5008_s29, %s5680_s20 }
  0xa4   : > { %p4394_p4 = scmp.ne.s32.totalorder %s5008_s29, %s4393_s0  ;;  %p4400_p12 = scmp.lt.u32.totalorder %s4398_s14, %s4393_s0 }
  0xa5   : > { %p4402_p9 = scmp.lt.u32.totalorder %s4393_s0, %s5008_s29 }
  0xa6   : > { %p4396_p5 = pnand %p4394_p4, %p4902_p6  ;;  %p4401_p3 = por %p4400_p12, %p4399_p8 }
  0xa8   : > { %p4397_p11 = pneg %p4396_p5  ;;  %p4403_p0 = por %p4402_p9, %p4401_p3 }
  0xaa   : > { %p4404_p1 = pnand %p4403_p0, %p4397_p11 }
  0xac   : > { %4407 = shalt.err (!%p4404_p1)
}
  0xad   : > { %s4408_s12 = scalar_lea.vmem %s900_s30, 16  ;;  %s4624_s21 = smov [#allocation7]  }
  0xae   : > { %p4409_p2 = scmp.ne.s32.totalorder %s900_s30, %s4408_s12  ;;  %s4413_s9 = sshll.u32 %s4624_s21, 4  ;;  %s4414_s9 = int_to_ptr.vmem [resolvable:$false] %s4413_s9 }
  0xaf   : > { %s4415_s8 = scalar_lea.vmem %s4414_s9, 32  ;;  %p4416_p4 = scmp.lt.s32.totalorder %s900_s30, %s4414_s9 }
  0xb0   : > { %p4411_p13 = pnand %p4409_p2, %p4902_p6  ;;  %p4417_p5 = scmp.lt.s32.totalorder %s4415_s8, %s4408_s12 }
  0xb2   : > { %p4412_p7 = pneg %p4411_p13  ;;  %p4418_p10 = por %p4417_p5, %p4416_p4 }
  0xb4   : > { %p4419_p8 = pnand %p4418_p10, %p4412_p7 }
  0xb6   : > { %4422 = shalt.err (!%p4419_p8)
}
  0xb7   : > { %p5681_p12 = scmp.ne.s32.totalorder %s5666_s13, 0  ;;  %s5682_s22 = sld [smem:[#allocation56_spill]] }
  0xb8   : > { %s930_s14 = scalar_lea.vmem [#allocation10], %s4867_s25 }
  0xb9   : > { %4133 = dma.hbm_to_vmem [thread:$0]  (!%p5681_p12), %s5008_s29, 16, %s900_s30, %s4896_s15  }
  0xba   : > { %s937_s3 = sshll.u32 %s930_s14, 4  ;;  %s938_s3 = int_to_ptr.vmem [resolvable:$true] %s937_s3 }
  0xbd   : > { %s5033_s19 = scalar_lea.hbm %s5682_s22, %s4977_s6  ;;  %s4428_s15 = scalar_lea.hbm %s5682_s22, 32 }
  0xbe   : > { %s4423_s11 = scalar_lea.hbm %s5033_s19, 16  ;;  %p4429_p9 = scmp.lt.u32.totalorder %s5033_s19, %s5682_s22 }
  0xbf   : > { %p4424_p10 = scmp.ne.s32.totalorder %s5033_s19, %s4423_s11  ;;  %p4430_p0 = scmp.lt.u32.totalorder %s4428_s15, %s4423_s11 }
  0xc0   : > { %p4432_p2 = scmp.lt.u32.totalorder %s4423_s11, %s5033_s19 }
  0xc1   : > { %p4426_p11 = pnand %p4424_p10, %p4902_p6  ;;  %p4431_p1 = por %p4430_p0, %p4429_p9 }
  0xc3   : > { %p4427_p3 = pneg %p4426_p11  ;;  %p4433_p13 = por %p4432_p2, %p4431_p1 }
  0xc5   : > { %p4434_p7 = pnand %p4433_p13, %p4427_p3 }
  0xc7   : > { %4437 = shalt.err (!%p4434_p7)
}
  0xc8   : > { %s4438_s9 = scalar_lea.vmem %s938_s3, 16  ;;  %s4625_s8 = smov [#allocation10]  }
  0xc9   : > { %p4439_p4 = scmp.ne.s32.totalorder %s938_s3, %s4438_s9  ;;  %s4443_s0 = sshll.u32 %s4625_s8, 4  ;;  %s4444_s0 = int_to_ptr.vmem [resolvable:$false] %s4443_s0 }
  0xca   : > { %s4445_s27 = scalar_lea.vmem %s4444_s0, 32  ;;  %p4446_p10 = scmp.lt.s32.totalorder %s938_s3, %s4444_s0 }
  0xcb   : > { %p4441_p5 = pnand %p4439_p4, %p4902_p6  ;;  %p4447_p11 = scmp.lt.s32.totalorder %s4445_s27, %s4438_s9 }
  0xcd   : > { %p4442_p8 = pneg %p4441_p5  ;;  %p4448_p12 = por %p4447_p11, %p4446_p10 }
  0xcf   : > { %p4449_p0 = pnand %p4448_p12, %p4442_p8 }
  0xd1   : > { %4452 = shalt.err (!%p4449_p0)
}
  0xd2   : > { %p5683_p9 = scmp.ne.s32.totalorder %s5666_s13, 0  ;;  %s5684_s24 = sld [smem:[#allocation58_spill]] }
  0xd3   : > { %s955_s21 = scalar_lea.vmem [#allocation11], %s4867_s25  ;;  %s953_s29 = scalar_lea.sflag [#allocation12], %s4867_s25 }
  0xd4   : > { %4139 = dma.hbm_to_vmem [thread:$0]  (!%p5683_p9), %s5033_s19, 16, %s938_s3, %s4949_s17  }
  0xd5   : > { %s962_s15 = sshll.u32 %s955_s21, 4  ;;  %s963_s15 = int_to_ptr.vmem [resolvable:$true] %s962_s15 }
  0xd8   : > { %s5058_s12 = scalar_lea.hbm %s5684_s24, %s4977_s6  ;;  %s4458_s19 = scalar_lea.hbm %s5684_s24, 32 }
  0xd9   : > { %s4453_s30 = scalar_lea.hbm %s5058_s12, 16  ;;  %p4459_p2 = scmp.lt.u32.totalorder %s5058_s12, %s5684_s24 }
  0xda   : > { %p4454_p12 = scmp.ne.s32.totalorder %s5058_s12, %s4453_s30  ;;  %p4460_p13 = scmp.lt.u32.totalorder %s4458_s19, %s4453_s30 }
  0xdb   : > { %p4462_p4 = scmp.lt.u32.totalorder %s4453_s30, %s5058_s12 }
  0xdc   : > { %p4456_p3 = pnand %p4454_p12, %p4902_p6  ;;  %p4461_p7 = por %p4460_p13, %p4459_p2 }
  0xde   : > { %p4457_p1 = pneg %p4456_p3  ;;  %p4463_p5 = por %p4462_p4, %p4461_p7 }
  0xe0   : > { %p4464_p8 = pnand %p4463_p5, %p4457_p1 }
  0xe2   : > { %4467 = shalt.err (!%p4464_p8)
}
  0xe3   : > { %s4468_s25 = scalar_lea.vmem %s963_s15, 16  ;;  %s4626_s8 = smov [#allocation11]  }
  0xe4   : > { %p4469_p10 = scmp.ne.s32.totalorder %s963_s15, %s4468_s25  ;;  %s4473_s0 = sshll.u32 %s4626_s8, 4  ;;  %s4474_s0 = int_to_ptr.vmem [resolvable:$false] %s4473_s0 }
  0xe5   : > { %s4475_s27 = scalar_lea.vmem %s4474_s0, 32  ;;  %p4476_p12 = scmp.lt.s32.totalorder %s963_s15, %s4474_s0 }
  0xe6   : > { %p4471_p11 = pnand %p4469_p10, %p4902_p6  ;;  %p4477_p3 = scmp.lt.s32.totalorder %s4475_s27, %s4468_s25 }
  0xe8   : > { %p4472_p0 = pneg %p4471_p11  ;;  %p4478_p9 = por %p4477_p3, %p4476_p12 }
  0xea   : > { %p4479_p2 = pnand %p4478_p9, %p4472_p0 }
  0xec   : > { %4482 = shalt.err (!%p4479_p2)
}
  0xed   : > { %p5685_p13 = scmp.ne.s32.totalorder %s5666_s13, 0  ;;  %p5686_p1 = scmp.ne.s32.totalorder %s5673_s16, 0 }
  0xef   : > { %4142 = dma.hbm_to_vmem [thread:$0]  (!%p5685_p13), %s5058_s12, 16, %s963_s15, %s953_s29  }
  0xf0   : > { %971 = sbr.rel (%p5686_p1) target bundleno = 5907 (0x1713), region = 120 }
  0xf7   : > { %s5082_s23 = sand.u32 1, %s4593_s7   ;;  %p5687_p6 = scmp.ne.s32.totalorder %s5660_s5, 0 }
  0xf8   : > { %s974_s14 = scalar_lea.sflag [#allocation3], %s5082_s23 }
  0xf9   : > { %4556 = dma.done.wait (%p5687_p6), %s974_s14, 16  }
  0xfa   : > { %4558 = vsyncadd (%p5687_p6), %s974_s14, 4294967280  ;;  %s981_s13 = sand.u32 1, %s4821_s28   ;;  %s3691_s12 = sshll.u32 %s5082_s23, 5 }
  0xfb   : > { %s982_s16 = scalar_lea.sflag [#allocation6], %s981_s13  ;;  %s5092_s21 = scalar_lea.vmem [#allocation5], %s3691_s12 }
  0xfc   : > { %4560 = dma.done.wait (%p5687_p6), %s982_s16, 528  }
  0xfd   : > { %4562 = vsyncadd (%p5687_p6), %s982_s16, 4294966768  ;;  %s999_s29 = scalar_lea.sflag [#allocation9], %s981_s13  ;;  %s5099_s30 = scalar_lea.vmem [#allocation8], %s3691_s12 }
  0xfe   : > { %5688 = sst [smem:[#allocation34_spill]] %s5099_s30 }
  0xff   : > { %4564 = dma.done.wait (%p5687_p6), %s999_s29, 528  }
 0x100   : > { %4566 = vsyncadd (%p5687_p6), %s999_s29, 4294966768  ;;  %s1016_s9 = scalar_lea.sflag [#allocation12], %s5082_s23 }
 0x101   : > { %4568 = dma.done.wait (%p5687_p6), %s1016_s9, 16  }
 0x102   : > { %4570 = vsyncadd (%p5687_p6), %s1016_s9, 4294967280  ;;  %s5615_s19 = sand.u32 1, %s4581_s2   ;;  %p1167_p9 = scmp.lt.s32.totalorder %s4605_s1, 1 }
 0x103   : > { %s3693_s3 = sshll.u32 %s5615_s19, 3  ;;  %p1184_p7 = scmp.lt.s32.totalorder %s4601_s26, 1 }
 0x104   : > { %s1168_s6 = scalar_select %p1167_p9, %s4605_s1, 1 }
 0x105   : > { %s5119_s25 = scalar_select %p1184_p7, %s4601_s26, 1 }
 0x106   : > { %s5121_s5 = sshll.u32 %s1168_s6, 3  ;;  %s3766_s8 = sshll.u32 %s1168_s6, 4 }
 0x107   : > { %s5689_s14 = sld [smem:[#allocation35_spill]]  ;;  %s5690_s29 = sld [smem:[#allocation36_spill]] }
 0x108   : > { %s5693_s7 = sld [smem:[#allocation42_spill]]  ;;  %s3767_s6 = sshll.u32 %s5119_s25, 5 }
 0x109   : > { %s5698_s27 = sld [smem:[#allocation48_spill]]  ;;  %s5699_s16 = sld [smem:[#allocation47_spill]] }
 0x10a   : > { %s5700_s28 = sld [smem:[#allocation49_spill]]  ;;  %s5701_s18 = sld [smem:[#allocation50_spill]] }
 0x10b   : > { %s3770_s15 = sshll.u32 %s5119_s25, 6  ;;  %s5703_s2 = sld [smem:[#allocation57_spill]] }
 0x10c   : > { %p3707_p4 = scmp.ne.s32.totalorder %s4601_s26, 0 }
 0x10d   : > { %s1170_s13 = scalar_lea.vmem %s5689_s14, %s5121_s5  ;;  %s5130_s9 = scalar_lea.vmem %s5690_s29, %s3766_s8  ;;  %vm1236_vm0 = vcmask (!%p3707_p4), 261120  }
 0x10e   : > { %s1186_s4 = scalar_lea.vmem %s5693_s7, %s5119_s25  ;;  %s5702_s7 = sld [smem:[#allocation51_spill]]  ;;  %v1232_v0 = vld [vmem:[%s1170_s13] sm:$0xff] (!%p3707_p4) }
 0x10f   : > { %s1209_s14 = scalar_lea.vmem %s5698_s27, %s5119_s25  ;;  %s5172_s8 = scalar_lea.vmem %s5699_s16, %s3767_s6  ;;  %v1233_v2 = vmul.f32 (!%p3707_p4), 5.656854, %v1232_v0 }
 0x110   : > { %s5177_s29 = scalar_lea.vmem %s5700_s28, %s3767_s6  ;;  %s1217_s22 = scalar_lea.vmem %s5701_s18, %s5119_s25 }
 0x111   : > { %s5192_s12 = scalar_lea.vmem %s5703_s2, %s3770_s15  ;;  %s5194_s16 = scalar_lea.vmem [#allocation13], %s3693_s3 }
 0x112   : > { %1231 = sbr.rel (%p3707_p4) target bundleno = 284 (0x11c), region = 148  ;;  %s5704_s30 = sld [smem:[#allocation37_spill]] (!%p3707_p4) }
 0x114   : > { %s5186_s20 = scalar_lea.vmem %s5702_s7, %s3767_s6 }
 0x118   : > { %v1234_v1 = vld [vmem:[%s5704_s30] sm:$0xff] (!%p3707_p4) }
 0x119   : > { %v1235_v3 = vadd.f32 %v1234_v1, %v1233_v2 }
 0x11b   : > { %1237 = vst.msk [vmem:[%s5194_s16] sm:$0xff] %vm1236_vm0, %v1235_v3 }
 0x11c PF: > { %vm1245_vm1 = vcmask 261120   ;;  %v1274_v11 = vld [vmem:[%s5172_s8] sm:$0xff]  ;;  %v1275_v12 = vld [vmem:[%s5172_s8 + $0x8] sm:$0xff]  ;;  %v1276_v13 = vld [vmem:[%s5172_s8 + $0x10] sm:$0xff]  ;;  %v4627_v14 = vmov 0.0|0.0   ;;  %vm4628_vm2 = vmmov 0  }
 0x11d   : > { %4032 = vmatprep.subr.bf16.mxu1 %v4627_v14  ;;  %v4033_v15 = vpack.c.bf16 %v1275_v12, %v1274_v11  ;;  %v1277_v16 = vld [vmem:[%s5172_s8 + $0x18] sm:$0xff]  ;;  %v4629_v17 = vmov 0.0   ;;  %v3708_v23 = vld [vmem:[%s1186_s4] ss:$0 sm:$0xff]  ;;  %s5706_s17 = sld [smem:[#allocation43_spill]]  ;;  %vm1363_vm3 = vcmask 64512  }
 0x11e   : > { %3859 = vmatprep.mubr.msk.f32.mxu1 %vm4628_vm2, %v4629_v17  ;;  %3872 = vmatprep.subr.mxu0 %v4629_v17  ;;  %v4036_v18 = vpack.c.bf16 %v1277_v16, %v1276_v13  ;;  %v3710_v28 = vld [vmem:[%s1209_s14] ss:$0 sm:$0xff]  ;;  %s4630_s4 = smov 104   ;;  %s4631_s15 = smov 120   ;;  %vm2019_vm4 = vcmask 130048   ;;  %vm2021_vm5 = vcmask 195584   ;;  %vm5359_vm6 = vmpackc.low %vm1363_vm3, %vm1363_vm3 }
 0x11f   : > { %3874 = vmatprep.mubr.msk.f32.mxu0 %vm4628_vm2, %v4629_v17  ;;  %4034 = vmatpush3.bf16.msra.mxu1 %v4033_v15  ;;  %s4632_s0 = smov 112   ;;  %s5709_s2 = sld [smem:[#allocation38_spill]]  ;;  %vm3194_vm7 = vcmask 523264  }
 0x120   : > { %4035 = vmatprep.subr.bf16.mxu1 %v4627_v14  ;;  %s4633_s1 = smov 8   ;;  %s4634_s30 = smov 16  }
 0x121   : > { %s4635_s3 = smov 24   ;;  %s5712_s6 = sld [smem:[#allocation44_spill]] }
 0x122   : > { %v5202_v4 = vld [vmem:[%s5194_s16] sm:$0xff]  ;;  %s5715_s18 = scalar_lea.vmem [#allocation2], %s5082_s23  ;;  %s5722_s27 = sld [smem:[#allocation45_spill]] }
 0x123   : > { %v1246_v5 = vsel %vm1245_vm1, %v5202_v4, 0.0  ;;  %4037 = vmatpush3.bf16.msra.mxu1 %v4036_v18  ;;  %s5707_s19 = scalar_lea.vmem %s5706_s17, %s5119_s25  ;;  %p3756_p5 = scmp.ne.s32.totalorder %s4601_s26, 1 }
 0x124   : > { %1247 = vadd.xlane.f32.xlu0 %v1246_v5  ;;  %3862 = vmatprep.subr.mxu1 %v4629_v17  ;;  %v3709_v25 = vld [vmem:[%s5707_s19] ss:$0 sm:$0xff]  ;;  %s5728_s13 = sld [smem:[#allocation40_spill]] (!%p3756_p5) }
 0x125   : > { %s5710_s28 = scalar_lea.vmem %s5709_s2, %s5121_s5 }
 0x126   : > { %v1241_v36 = vld [vmem:[%s5710_s28] sm:$0xff] }
 0x127   : > { %s5713_s8 = scalar_lea.vmem %s5712_s6, %s5119_s25 }
 0x128   : > { %s5723_s2 = scalar_lea.vmem %s5722_s27, %s5119_s25 }
 0x1b1   : > { %v1248_v6 = vpop.xlane.xlu0 %1247 }
 0x1b2   : > { %v1250_v7 = vmul.f32 0.03125, %v1248_v6 }
 0x1b4   : > { %v1251_v8 = vsub.f32 %v5202_v4, %v1250_v7 }
 0x1b6   : > { %v1252_v9 = vmul.f32 %v1251_v8, %v1251_v8 }
 0x1b8   : > { %v1253_v10 = vsel %vm1245_vm1, %v1252_v9, 0.0 }
 0x1b9   : > { %1254 = vadd.xlane.f32.xlu0 %v1253_v10 }
 0x246   : > { %v1255_v19 = vpop.xlane.xlu0 %1254 }
 0x247   : > { %v1256_v20 = vmul.f32 0.03125, %v1255_v19 }
 0x249   : > { %v1257_v21 = vadd.f32 1e-05, %v1256_v20 }
 0x24b   : > { %4263 = vrsqrt.f32 %v1257_v21 }
 0x255   : > { %v4264_v22 = vpop.eup %4263 }
 0x256   : > { %v1259_v24 = vmul.f32 %v4264_v22, %v1251_v8 }
 0x258   : > { %v1266_v26 = vmul.f32 %v3708_v23, %v1259_v24 }
 0x25a   : > { %v1273_v27 = vadd.f32 %v3709_v25, %v1266_v26 }
 0x25c   : > { %3860 = vmatmul.mubr.msk.f32.vlgmr.msra.gmra.mrb[0].mxu1 %vm1245_vm1, %v1273_v27 }
 0x25d   : > { %3864 = vmatprep.mubr.msk.f32.mxu1 %vm4628_vm2, %v4629_v17 }
 0x32f   : > { %v1359_v29 = vpop.f32.mrb[0].mxu1 }
 0x330   : > { %v1360_v30 = vadd.f32 %v3710_v28, %v1359_v29  ;;  %v3861_v31 = vpop.f32.mrb[1].mxu1  ;;  %v1279_v29 = vld [vmem:[%s5177_s29] sm:$0xff] }
 0x332   : > { %1845 = vrot.lane.b32.xlu0 %v1360_v30, %s4630_s4  ;;  %1523 = vrot.lane.b32.xlu1 %v1360_v30, %s4631_s15 }
 0x333   : > { %3863 = vmatpush3.xpose.msk.msra.mxu1 %vm1363_vm3, %v1360_v30 }
 0x334   : > { %3867 = vmatprep.subr.mxu1 %v4629_v17 }
 0x336   : > { %3865 = vmatmul.mubr.msk.f32.vlgmr.msra.gmra.mrb[2].mxu1 %vm1363_vm3, %v1360_v30  ;;  %1684 = vrot.lane.b32.xlu1 %v1360_v30, %s4632_s0 }
 0x337   : > { %3868 = vmatpush3.msra.mxu1 %v1360_v30  ;;  %3869 = vmatprep.mubr.msk.f32.mxu1 %vm4628_vm2, %v4629_v17  ;;  %v1280_v30 = vld [vmem:[%s5177_s29 + $0x8] sm:$0xff] }
 0x338   : > { %3877 = vmatprep.subr.mxu1 %v4629_v17  ;;  %v4039_v31 = vpack.c.bf16 %v1280_v30, %v1279_v29 }
 0x3a4   : > { %v5247_v32 = vpop.permute.xlu1 %1523  ;;  %v5261_v34 = vpop.permute.xlu0 %1845 }
 0x3a5   : > { %3873 = vmatpush3.xpose.msk.msra.mxu0 %vm1363_vm3, %v5247_v32 }
 0x3a6   : > { %3882 = vmatprep.subr.mxu0 %v4629_v17 }
 0x3a8   : > { %3875 = vmatmul.mubr.msk.f32.vlgmr.msra.gmra.mrb[0].mxu0 %vm1363_vm3, %v5247_v32  ;;  %v5254_v33 = vpop.permute.xlu1 %1684 }
 0x3a9   : > { %3883 = vmatpush3.xpose.msk.msra.mxu0 %vm1363_vm3, %v5254_v33  ;;  %3884 = vmatprep.mubr.msk.f32.mxu0 %vm4628_vm2, %v4629_v17 }
 0x3aa   : > { %3892 = vmatprep.subr.mxu0 %v4629_v17 }
 0x3ac   : > { %3885 = vmatmul.mubr.msk.f32.vlgmr.msra.gmra.mrb[2].mxu0 %vm1363_vm3, %v5254_v33 }
 0x3ad   : > { %3893 = vmatpush3.xpose.msk.msra.mxu0 %vm1363_vm3, %v5261_v34  ;;  %3894 = vmatprep.mubr.msk.f32.mxu0 %vm4628_vm2, %v4629_v17 }
 0x3ae   : > { %4038 = vmatprep.subr.bf16.mxu0 %v4627_v14 }
 0x3b0   : > { %3895 = vmatmul.mubr.msk.f32.vlgmr.msra.gmra.mrb[4].mxu0 %vm1363_vm3, %v5261_v34 }
 0x3b1   : > { %3910 = vmatprep.mubr.msk.f32.mxu0 %vm4628_vm2, %v4629_v17  ;;  %4040 = vmatpush3.bf16.msra.mxu0 %v4039_v31 }
 0x3b2   : > { %4041 = vmatprep.subr.bf16.mxu0 %v4627_v14 }
 0x409   : > { %v1433_v35 = vpop.f32.mrb[2].mxu1 }
 0x40a   : > { %v1437_v37 = vmul.f32 0.35355338, %v1433_v35  ;;  %v3866_v38 = vpop.f32.mrb[3].mxu1 }
 0x40c   : > { %v1438_v39 = vadd.f32 %v1437_v37, %v1241_v36 }
 0x40e   : > { %v1439_v40 = vsel %vm1363_vm3, %v1438_v39, -inf }
 0x40f   : > { %1440 = vmax.xlane.f32.xlu1 %v1439_v40 }
 0x47b   : > { %v1593_v41 = vpop.f32.mrb[0].mxu0 }
 0x47c   : > { %v1597_v42 = vmul.f32 0.35355338, %v1593_v41  ;;  %v3876_v43 = vpop.f32.mrb[1].mxu0 }
 0x47e   : > { %v1598_v44 = vadd.f32 %v1597_v42, %v1241_v36 }
 0x47f   : > { %v1754_v45 = vpop.f32.mrb[2].mxu0 }
 0x480   : > { %v1758_v46 = vmul.f32 0.35355338, %v1754_v45  ;;  %v3886_v47 = vpop.f32.mrb[3].mxu0  ;;  %v1599_v48 = vsel %vm1363_vm3, %v1598_v44, -inf }
 0x481   : > { %1600 = vmax.xlane.f32.xlu0 %v1599_v48  ;;  %v3724_v47 = vld [vmem:[%s1217_s22] ss:$0 sm:$0xff]  ;;  %s5729_s22 = sld [smem:[#allocation41_spill]] (!%p3756_p5) }
 0x482   : > { %v1759_v49 = vadd.f32 %v1758_v46, %v1241_v36 }
 0x483   : > { %v1915_v50 = vpop.f32.mrb[4].mxu0 }
 0x484   : > { %v1919_v51 = vmul.f32 0.35355338, %v1915_v50  ;;  %v3896_v52 = vpop.f32.mrb[5].mxu0  ;;  %v1760_v53 = vsel %vm1363_vm3, %v1759_v49, -inf }
 0x485   : > { %1761 = vmax.xlane.f32.xlu1 %v1760_v53  ;;  %v2132_v53 = vld [vmem:[%s5186_s20] sm:$0xff] }
 0x486   : > { %v1920_v54 = vadd.f32 %v1919_v51, %v1241_v36 }
 0x488   : > { %v1921_v55 = vsel %vm1363_vm3, %v1920_v54, -inf }
 0x489   : > { %1922 = vmax.xlane.f32.xlu1 %v1921_v55 }
 0x49c   : > { %v1441_v56 = vpop.xlane.xlu1 %1440 }
 0x49d   : > { %v1442_v57 = vsub.f32 %v1438_v39, %v1441_v56 }
 0x49f   : > { %v1443_v58 = vmul.f32 1.442695, %v1442_v57 }
 0x4a1   : > { %4265 = vpow2.f32 %v1443_v58 }
 0x4ab   : > { %v4266_v59 = vpop.eup %4265 }
 0x4ac   : > { %v1445_v60 = vsel %vm1363_vm3, %v4266_v59, 0.0 }
 0x4ad   : > { %1446 = vadd.xlane.f32.xlu1 %v1445_v60  ;;  %v2134_v60 = vld [vmem:[%s5186_s20 + $0x10] sm:$0xff] }
 0x50e   : > { %v1601_v61 = vpop.xlane.xlu0 %1600 }
 0x50f   : > { %v1602_v62 = vsub.f32 %v1598_v44, %v1601_v61  ;;  %v2135_v61 = vld [vmem:[%s5186_s20 + $0x18] sm:$0xff] }
 0x511   : > { %v1603_v63 = vmul.f32 1.442695, %v1602_v62  ;;  %v4048_v62 = vpack.c.bf16 %v2135_v61, %v2134_v60 }
 0x512   : > { %v1762_v0 = vpop.xlane.xlu1 %1761 }
 0x513   : > { %4267 = vpow2.f32 %v1603_v63  ;;  %v1763_v1 = vsub.f32 %v1759_v49, %v1762_v0  ;;  %v1239_v63 = vld [vmem:[%s5130_s9] sm:$0xff]  ;;  %v1240_v0 = vld [vmem:[%s5130_s9 + $0x8] sm:$0xff]  ;;  %s5714_s9 = scalar_lea.vmem %s5580_s10, %s5119_s25 }
 0x515   : > { %v1764_v2 = vmul.f32 1.442695, %v1763_v1 }
 0x516   : > { %v1923_v3 = vpop.xlane.xlu1 %1922 }
 0x517   : > { %4269 = vpow2.f32 %v1764_v2  ;;  %v1924_v5 = vsub.f32 %v1920_v54, %v1923_v3  ;;  %v2133_v54 = vld [vmem:[%s5186_s20 + $0x8] sm:$0xff] }
 0x518   : > { %v4045_v55 = vpack.c.bf16 %v2133_v54, %v2132_v53 }
 0x519   : > { %v1925_v6 = vmul.f32 1.442695, %v1924_v5 }
 0x51b   : > { %4271 = vpow2.f32 %v1925_v6  ;;  %v3726_v6 = vld [vmem:[%s5713_s8] ss:$0 sm:$0xff] }
 0x51d   : > { %v4268_v7 = vpop.eup %4267 }
 0x51e   : > { %v1605_v8 = vsel %vm1363_vm3, %v4268_v7, 0.0 }
 0x51f   : > { %1606 = vadd.xlane.f32.xlu1 %v1605_v8  ;;  %v3727_v8 = vld [vmem:[%s5714_s9] ss:$0 sm:$0xff] }
 0x521   : > { %v4270_v9 = vpop.eup %4269 }
 0x522   : > { %v1766_v10 = vsel %vm1363_vm3, %v4270_v9, 0.0 }
 0x523   : > { %1767 = vadd.xlane.f32.xlu1 %v1766_v10 }
 0x525   : > { %v4272_v11 = vpop.eup %4271 }
 0x526   : > { %v1927_v12 = vsel %vm1363_vm3, %v4272_v11, 0.0 }
 0x527   : > { %1928 = vadd.xlane.f32.xlu0 %v1927_v12 }
 0x53a   : > { %v1447_v13 = vpop.xlane.xlu1 %1446 }
 0x53b   : > { %4273 = vrcp.f32 %v1447_v13 }
 0x545   : > { %v4274_v15 = vpop.eup %4273 }
 0x546   : > { %v1449_v16 = vmul.f32 %v4274_v15, %v4266_v59 }
 0x548   : > { %3870 = vmatmul.mubr.msk.f32.vlgmr.msra.gmra.mrb[4].mxu1 %vm1363_vm3, %v1449_v16 }
 0x549   : > { %3878 = vmatpush3.msra.mxu1 %v5247_v32  ;;  %3879 = vmatprep.mubr.msk.f32.mxu1 %vm4628_vm2, %v4629_v17  ;;  %v1281_v32 = vld [vmem:[%s5177_s29 + $0x10] sm:$0xff] }
 0x54a   : > { %3887 = vmatprep.subr.mxu1 %v4629_v17 }
 0x5ac   : > { %v1607_v18 = vpop.xlane.xlu1 %1606 }
 0x5ad   : > { %4275 = vrcp.f32 %v1607_v18 }
 0x5b0   : > { %v1768_v19 = vpop.xlane.xlu1 %1767 }
 0x5b1   : > { %4277 = vrcp.f32 %v1768_v19 }
 0x5b4   : > { %v1929_v20 = vpop.xlane.xlu0 %1928 }
 0x5b5   : > { %4279 = vrcp.f32 %v1929_v20 }
 0x5b7   : > { %v4276_v21 = vpop.eup %4275 }
 0x5b8   : > { %v1609_v22 = vmul.f32 %v4276_v21, %v4268_v7 }
 0x5ba   : > { %3880 = vmatmul.mubr.msk.f32.vlgmr.msra.gmra.mrb[6].mxu1 %vm1363_vm3, %v1609_v22 }
 0x5bb   : > { %v4278_v23 = vpop.eup %4277  ;;  %3888 = vmatpush3.msra.mxu1 %v5254_v33  ;;  %3889 = vmatprep.mubr.msk.f32.mxu1 %vm4628_vm2, %v4629_v17  ;;  %v1282_v33 = vld [vmem:[%s5177_s29 + $0x18] sm:$0xff]  ;;  %s5726_s29 = scalar_lea.vmem [#allocation10], %s5082_s23 }
 0x5bc   : > { %v1770_v24 = vmul.f32 %v4278_v23, %v4270_v9  ;;  %3897 = vmatprep.subr.mxu1 %v4629_v17 }
 0x5be   : > { %3890 = vmatmul.mubr.msk.f32.vlgmr.msra.gmra.mrb[8].mxu1 %vm1363_vm3, %v1770_v24 }
 0x5bf   : > { %v4280_v25 = vpop.eup %4279  ;;  %3898 = vmatpush3.msra.mxu1 %v5261_v34  ;;  %3899 = vmatprep.mubr.msk.f32.mxu1 %vm4628_vm2, %v4629_v17  ;;  %v4042_v34 = vpack.c.bf16 %v1282_v33, %v1281_v32 }
 0x5c0   : > { %v1931_v26 = vmul.f32 %v4280_v25, %v4272_v11  ;;  %4044 = vmatprep.subr.bf16.mxu1 %v4627_v14  ;;  %v3728_v11 = vld [vmem:[%s5715_s18] ss:$0 sm:$0xff] }
 0x5c1   : > { %4043 = vmatpush3.bf16.msra.mxu0 %v4042_v34 }
 0x5c2   : > { %3900 = vmatmul.mubr.msk.f32.vlgmr.msra.gmra.mrb[10].mxu1 %vm1363_vm3, %v1931_v26  ;;  %4051 = vmatprep.subr.bf16.mxu0 %v4045_v55 }
 0x5c3   : > { %3921 = vmatprep.mubr.msk.f32.mxu1 %vm4628_vm2, %v4629_v17  ;;  %4046 = vmatpush3.bf16.msra.mxu1 %v4045_v55 }
 0x5c4   : > { %4047 = vmatprep.subr.bf16.mxu1 %v4627_v14 }
 0x5c7   : > { %4049 = vmatpush3.bf16.msra.mxu1 %v4048_v62 }
 0x5c8   : > { %4058 = vmatprep.subr.bf16.mxu1 %v4627_v14 }
 0x61b   : > { %v1519_v27 = vpop.f32.mrb[4].mxu1 }
 0x61c   : > { %v3871_v28 = vpop.f32.mrb[5].mxu1 }
 0x68d   : > { %v1680_v35 = vpop.f32.mrb[6].mxu1 }
 0x68e   : > { %2007 = vrot.lane.b32.xlu1 %v1680_v35, %s4633_s1  ;;  %v3881_v36 = vpop.f32.mrb[7].mxu1 }
 0x691   : > { %v1841_v37 = vpop.f32.mrb[8].mxu1 }
 0x692   : > { %2011 = vrot.lane.b32.xlu0 %v1841_v37, %s4634_s30  ;;  %v3891_v38 = vpop.f32.mrb[9].mxu1 }
 0x695   : > { %v2002_v39 = vpop.f32.mrb[10].mxu1 }
 0x696   : > { %2015 = vrot.lane.b32.xlu1 %v2002_v39, %s4635_s3  ;;  %v3901_v40 = vpop.f32.mrb[11].mxu1 }
 0x700   : > { %v2008_v41 = vpop.permute.xlu1 %2007 }
 0x701   : > { %v2018_v43 = vsel %vm1363_vm3, %v1519_v27, %v2008_v41 }
 0x704   : > { %v2012_v42 = vpop.permute.xlu0 %2011 }
 0x705   : > { %v2020_v44 = vsel %vm2019_vm4, %v2018_v43, %v2012_v42 }
 0x708   : > { %v2016_v45 = vpop.permute.xlu1 %2015 }
 0x709   : > { %v2022_v46 = vsel %vm2021_vm5, %v2020_v44, %v2016_v45 }
 0x70a   : > { %3911 = vmatmul.mubr.msk.f32.vlgmr.msra.gmra.mrb[6].mxu0 %vm1245_vm1, %v2022_v46 }
 0x70b   : > { %4053 = vmatpush3.bf16.msra.mxu0 %v4045_v55  ;;  %3932 = vmatprep.mubr.msk.f32.mxu0 %vm1245_vm1, %v1239_v63 }
 0x70c   : > { %4055 = vmatprep.subr.bf16.mxu0 %v4048_v62 }
 0x70f   : > { %4057 = vmatpush3.bf16.msra.mxu0 %v4048_v62 }
 0x710   : > { %4062 = vmatprep.subr.bf16.mxu0 %v4627_v14 }
 0x712   : > { %3933 = vmatmul.mubr.msk.f32.vlgmr.msra.gmra.mrb[8].mxu0 %vm1245_vm1, %v1240_v0 }
 0x713   : > { %3946 = vmatprep.mubr.msk.f32.mxu0 %vm4628_vm2, %v4629_v17 }
 0x7dd   : > { %v2098_v48 = vpop.f32.mrb[6].mxu0 }
 0x7de   : > { %v2099_v49 = vadd.f32 %v3724_v47, %v2098_v48  ;;  %v3912_v50 = vpop.f32.mrb[7].mxu0 }
 0x7e0   : > { %v5323_v51 = vadd.f32 %v2099_v49, %v5202_v4 }
 0x7e2   : > { %v2105_v52 = vsel %vm1245_vm1, %v5323_v51, 0.0 }
 0x7e3   : > { %2106 = vadd.xlane.f32.xlu1 %v2105_v52 }
 0x7e5   : > { %v3934_v12 = vpop.f32.mrb[8].mxu0 }
 0x7e6   : > { %v2299_v13 = vadd.f32 %v3934_v12, %v3728_v11  ;;  %v2293_v15 = vpop.f32.mrb[9].mxu0 }
 0x7e7   : > { %v2294_v16 = vadd.f32 %v3728_v11, %v2293_v15 }
 0x7e9   : > { %v4059_v19 = vpack.c.bf16 %v2299_v13, %v2294_v16  ;;  %v5363_v20 = vpack.i.bf16 %v2299_v13, %v2294_v16 }
 0x7eb   : > { %4064 = vmatpush3.bf16.msra.mxu0 %v4059_v19 }
 0x7ec   : > { %4069 = vmatprep.subr.bf16.mxu0 %v4627_v14 }
 0x870   : > { %v2107_v56 = vpop.xlane.xlu1 %2106 }
 0x871   : > { %v2108_v57 = vmul.f32 0.03125, %v2107_v56 }
 0x873   : > { %v2109_v4 = vsub.f32 %v5323_v51, %v2108_v57 }
 0x875   : > { %v2110_v58 = vmul.f32 %v2109_v4, %v2109_v4 }
 0x877   : > { %v2111_v59 = vsel %vm1245_vm1, %v2110_v58, 0.0 }
 0x878   : > { %2112 = vadd.xlane.f32.xlu0 %v2111_v59 }
 0x88e   : > { %4249 = vrot.lane.b32.xlu0 %v5363_v20, %s4631_s15 }
 0x905   : > { %v2113_v1 = vpop.xlane.xlu0 %2112 }
 0x906   : > { %v2114_v2 = vmul.f32 0.03125, %v2113_v1 }
 0x908   : > { %v2115_v3 = vadd.f32 1e-05, %v2114_v2 }
 0x909   : > { %v4250_v21 = vpop.permute.xlu0 %4249 }
 0x90a   : > { %4281 = vrsqrt.f32 %v2115_v3  ;;  %v4252_v22 = vunpack.i.h.bf16 %v4250_v21  ;;  %v4251_v23 = vunpack.i.l.bf16 %v4250_v21 }
 0x90c   : > { %v4066_v25 = vpack.c.bf16 %v4252_v22, %v4251_v23 }
 0x914   : > { %v4282_v5 = vpop.eup %4281 }
 0x915   : > { %v2117_v7 = vmul.f32 %v4282_v5, %v2109_v4 }
 0x917   : > { %v2124_v9 = vmul.f32 %v3726_v6, %v2117_v7 }
 0x919   : > { %v2131_v10 = vadd.f32 %v3727_v8, %v2124_v9 }
 0x91b   : > { %3922 = vmatmul.mubr.msk.f32.vlgmr.msra.gmra.mrb[12].mxu1 %vm1245_vm1, %v2131_v10 }
 0x91c   : > { %3939 = vmatprep.mubr.msk.f32.mxu1 %vm4628_vm2, %v4629_v17  ;;  %4061 = vmatpush3.bf16.xpose.msk.msra.mxu1 %vm5359_vm6, %v4059_v19 }
 0x91d   : > { %4065 = vmatprep.subr.bf16.mxu1 %v4627_v14 }
 0x9ee   : > { %v2217_v24 = vpop.f32.mrb[12].mxu1 }
 0x9ef   : > { %v5371_v26 = vadd.f32 %v3728_v11, %v2217_v24  ;;  %v3923_v27 = vpop.f32.mrb[13].mxu1 }
 0x9f1   : > { %2467 = vrot.lane.b32.xlu1 %v5371_v26, %s4631_s15  ;;  %3940 = vmatmul.mubr.msk.f32.vlgmr.msra.gmra.mrb[14].mxu1 %vm1363_vm3, %v5371_v26  ;;  %s5718_s15 = sld [smem:[#allocation39_spill]] }
 0x9f2   : > { %4068 = vmatpush3.bf16.xpose.msk.msra.mxu1 %vm5359_vm6, %v4066_v25  ;;  %3953 = vmatprep.mubr.msk.f32.mxu1 %vm4628_vm2, %v4629_v17 }
 0x9f3   : > { %4076 = vmatprep.subr.bf16.mxu1 %v4627_v14 }
 0x9f7   : > { %s5719_s14 = scalar_lea.vmem %s5718_s15, %s5121_s5  ;;  %s5721_s5 = scalar_lea.vmem [#allocation7], %s5082_s23 }
 0x9f8   : > { %v5390_v30 = vld [vmem:[%s5719_s14] sm:$0xff] }
 0xa63   : > { %v2468_v28 = vpop.permute.xlu1 %2467 }
 0xa64   : > { %3954 = vmatmul.mubr.msk.f32.vlgmr.msra.gmra.mrb[16].mxu1 %vm1363_vm3, %v2468_v28 }
 0xa65   : > { %3974 = vmatprep.mubr.msk.f32.mxu1 %vm4628_vm2, %v4629_v17 }
 0xac4   : > { %v2377_v29 = vpop.f32.mrb[14].mxu1 }
 0xac5   : > { %v2381_v31 = vmul.f32 0.35355338, %v2377_v29  ;;  %v3941_v32 = vpop.f32.mrb[15].mxu1 }
 0xac7   : > { %v2382_v33 = vadd.f32 %v2381_v31, %v5390_v30 }
 0xac9   : > { %v2383_v34 = vsel %vm2019_vm4, %v2382_v33, -inf }
 0xaca   : > { %2384 = vmax.xlane.f32.xlu1 %v2383_v34 }
 0xb37   : > { %v2545_v35 = vpop.f32.mrb[16].mxu1 }
 0xb38   : > { %v2549_v36 = vmul.f32 0.35355338, %v2545_v35  ;;  %v3955_v37 = vpop.f32.mrb[17].mxu1 }
 0xb39   : > { %v2137_v37 = vld [vmem:[%s5092_s21] sm:$0xff] }
 0xb3a   : > { %v2550_v38 = vadd.f32 %v2549_v36, %v5390_v30 }
 0xb3c   : > { %v2551_v39 = vsel %vm2019_vm4, %v2550_v38, -inf }
 0xb3d   : > { %2552 = vmax.xlane.f32.xlu0 %v2551_v39  ;;  %v2139_v39 = vld [vmem:[%s5092_s21 + $0x10] sm:$0xff] }
 0xb57   : > { %v2385_v40 = vpop.xlane.xlu1 %2384 }
 0xb58   : > { %v2386_v41 = vsub.f32 %v2382_v33, %v2385_v40 }
 0xb5a   : > { %v2387_v42 = vmul.f32 1.442695, %v2386_v41  ;;  %v2140_v41 = vld [vmem:[%s5092_s21 + $0x18] sm:$0xff] }
 0xb5c   : > { %4283 = vpow2.f32 %v2387_v42  ;;  %v4090_v42 = vpack.c.bf16 %v2140_v41, %v2139_v39 }
 0xb66   : > { %v4284_v43 = vpop.eup %4283 }
 0xb67   : > { %v2389_v44 = vsel %vm2019_vm4, %v4284_v43, 0.0 }
 0xb68   : > { %2390 = vadd.xlane.f32.xlu0 %v2389_v44 }
 0xb7e   : > { %4254 = vrot.lane.b32.xlu0 %v5363_v20, %s4632_s0 }
 0xbca   : > { %v2553_v45 = vpop.xlane.xlu0 %2552 }
 0xbcb   : > { %v2554_v46 = vsub.f32 %v2550_v38, %v2553_v45  ;;  %v2138_v38 = vld [vmem:[%s5092_s21 + $0x8] sm:$0xff]  ;;  %s5720_s21 = sld [smem:[#allocation34_spill]] }
 0xbcc   : > { %v4087_v40 = vpack.c.bf16 %v2138_v38, %v2137_v37 }
 0xbcd   : > { %v2555_v47 = vmul.f32 1.442695, %v2554_v46 }
 0xbcf   : > { %4285 = vpow2.f32 %v2555_v47 }
 0xbd9   : > { %v4286_v48 = vpop.eup %4285 }
 0xbda   : > { %v2557_v49 = vsel %vm2019_vm4, %v4286_v48, 0.0 }
 0xbdb   : > { %2558 = vadd.xlane.f32.xlu1 %v2557_v49 }
 0xbec   : > { %2637 = vrot.lane.b32.xlu1 %v5371_v26, %s4632_s0 }
 0xbf5   : > { %v2391_v50 = vpop.xlane.xlu0 %2390 }
 0xbf6   : > { %4287 = vrcp.f32 %v2391_v50 }
 0xbf9   : > { %v4255_v52 = vpop.permute.xlu0 %4254 }
 0xbfa   : > { %v4257_v53 = vunpack.i.h.bf16 %v4255_v52  ;;  %v4256_v54 = vunpack.i.l.bf16 %v4255_v52  ;;  %v3748_v52 = vld [vmem:[%s5721_s5] ss:$0 sm:$0xff] }
 0xbfc   : > { %v4073_v55 = vpack.c.bf16 %v4257_v53, %v4256_v54 }
 0xbfe   : > { %4078 = vmatpush3.bf16.msra.mxu1 %v4073_v55 }
 0xbff   : > { %4079 = vmatprep.subr.bf16.mxu1 %v4627_v14 }
 0xc00   : > { %v4288_v56 = vpop.eup %4287 }
 0xc01   : > { %v2393_v57 = vmul.f32 %v4288_v56, %v4284_v43 }
 0xc03   : > { %3947 = vmatmul.mubr.msk.f32.vlgmr.msra.gmra.mrb[10].mxu0 %vm2019_vm4, %v2393_v57 }
 0xc04   : > { %4071 = vmatpush3.bf16.msra.mxu0 %v4066_v25  ;;  %3960 = vmatprep.mubr.msk.f32.mxu0 %vm4628_vm2, %v4629_v17 }
 0xc05   : > { %4072 = vmatprep.subr.bf16.mxu0 %v4627_v14 }
 0xc68   : > { %v2559_v4 = vpop.xlane.xlu1 %2558 }
 0xc69   : > { %4289 = vrcp.f32 %v2559_v4 }
 0xc6c   : > { %v2638_v60 = vpop.permute.xlu1 %2637 }
 0xc73   : > { %v4290_v58 = vpop.eup %4289 }
 0xc74   : > { %v2561_v59 = vmul.f32 %v4290_v58, %v4286_v48 }
 0xc76   : > { %3961 = vmatmul.mubr.msk.f32.vlgmr.msra.gmra.mrb[12].mxu0 %vm2019_vm4, %v2561_v59 }
 0xc77   : > { %4075 = vmatpush3.bf16.xpose.msk.msra.mxu0 %vm5359_vm6, %v4073_v55  ;;  %3967 = vmatprep.mubr.msk.f32.mxu0 %vm4628_vm2, %v4629_v17 }
 0xc78   : > { %4083 = vmatprep.subr.bf16.mxu0 %v4627_v14 }
 0xc7e   : > { %3968 = vmatmul.mubr.msk.f32.vlgmr.msra.gmra.mrb[14].mxu0 %vm1363_vm3, %v2638_v60 }
 0xc7f   : > { %3988 = vmatprep.mubr.msk.f32.mxu0 %vm4628_vm2, %v4629_v17 }
 0xcd6   : > { %v5416_v61 = vpop.f32.mrb[10].mxu0 }
 0xcd7   : > { %v3948_v62 = vpop.f32.mrb[11].mxu0 }
 0xcd8   : > { %v3102_v62 = vld [vmem:[%s5720_s21 + $0x8] sm:$0xff] }
 0xd49   : > { %v2633_v63 = vpop.f32.mrb[12].mxu0 }
 0xd4a   : > { %v3962_v0 = vpop.f32.mrb[13].mxu0 }
 0xd4b   : > { %v3104_v0 = vld [vmem:[%s5720_s21 + $0x18] sm:$0xff] }
 0xd51   : > { %v2715_v1 = vpop.f32.mrb[14].mxu0 }
 0xd52   : > { %v2719_v2 = vmul.f32 0.35355338, %v2715_v1  ;;  %v3969_v3 = vpop.f32.mrb[15].mxu0 }
 0xd53   : > { %v3187_v3 = vld [vmem:[%s5192_s12 + $0x8] sm:$0xff] }
 0xd54   : > { %v2720_v5 = vadd.f32 %v2719_v2, %v5390_v30  ;;  %v3186_v2 = vld [vmem:[%s5192_s12] sm:$0xff] }
 0xd56   : > { %v2721_v6 = vsel %vm2019_vm4, %v2720_v5, -inf }
 0xd57   : > { %2722 = vmax.xlane.f32.xlu1 %v2721_v6  ;;  %v4099_v6 = vpack.c.bf16 %v3187_v3, %v3186_v2 }
 0xd68   : > { %2807 = vrot.lane.b32.xlu1 %v5371_v26, %s4630_s4 }
 0xde4   : > { %v2723_v7 = vpop.xlane.xlu1 %2722 }
 0xde5   : > { %v2724_v8 = vsub.f32 %v2720_v5, %v2723_v7  ;;  %v3188_v5 = vld [vmem:[%s5192_s12 + $0x10] sm:$0xff]  ;;  %v3189_v7 = vld [vmem:[%s5192_s12 + $0x18] sm:$0xff] }
 0xde7   : > { %v2725_v9 = vmul.f32 1.442695, %v2724_v8  ;;  %v4102_v8 = vpack.c.bf16 %v3189_v7, %v3188_v5 }
 0xde9   : > { %4291 = vpow2.f32 %v2725_v9  ;;  %v3190_v9 = vld [vmem:[%s5192_s12 + $0x20] sm:$0xff] }
 0xdf3   : > { %v4292_v10 = vpop.eup %4291 }
 0xdf4   : > { %v2727_v11 = vsel %vm2019_vm4, %v4292_v10, 0.0 }
 0xdf5   : > { %2728 = vadd.xlane.f32.xlu0 %v2727_v11 }
 0xe0b   : > { %4259 = vrot.lane.b32.xlu0 %v5363_v20, %s4630_s4  ;;  %v2808_v20 = vpop.permute.xlu1 %2807 }
 0xe82   : > { %v2729_v12 = vpop.xlane.xlu0 %2728 }
 0xe83   : > { %4293 = vrcp.f32 %v2729_v12 }
 0xe86   : > { %v4260_v13 = vpop.permute.xlu0 %4259 }
 0xe87   : > { %v4262_v15 = vunpack.i.h.bf16 %v4260_v13  ;;  %v4261_v16 = vunpack.i.l.bf16 %v4260_v13 }
 0xe89   : > { %v4080_v19 = vpack.c.bf16 %v4262_v15, %v4261_v16 }
 0xe8b   : > { %4085 = vmatpush3.bf16.msra.mxu0 %v4080_v19 }
 0xe8c   : > { %4086 = vmatprep.subr.bf16.mxu0 %v4627_v14 }
 0xe8d   : > { %v4294_v21 = vpop.eup %4293 }
 0xe8e   : > { %v2731_v22 = vmul.f32 %v4294_v21, %v4292_v10  ;;  %v3191_v10 = vld [vmem:[%s5192_s12 + $0x28] sm:$0xff] }
 0xe8f   : > { %v4105_v11 = vpack.c.bf16 %v3191_v10, %v3190_v9 }
 0xe90   : > { %3975 = vmatmul.mubr.msk.f32.vlgmr.msra.gmra.mrb[18].mxu1 %vm2019_vm4, %v2731_v22 }
 0xe91   : > { %4082 = vmatpush3.bf16.xpose.msk.msra.mxu1 %vm5359_vm6, %v4080_v19  ;;  %3981 = vmatprep.mubr.msk.f32.mxu1 %vm4628_vm2, %v4629_v17  ;;  %v3750_v19 = vld [vmem:[%s5723_s2] ss:$0 sm:$0xff] }
 0xe92   : > { %4092 = vmatprep.subr.bf16.mxu1 %v4627_v14 }
 0xe98   : > { %3982 = vmatmul.mubr.msk.f32.vlgmr.msra.gmra.mrb[20].mxu1 %vm1363_vm3, %v2808_v20 }
 0xe99   : > { %4010 = vmatprep.mubr.msk.f32.mxu1 %vm4628_vm2, %v4629_v17 }
 0xf63   : > { %v2803_v23 = vpop.f32.mrb[18].mxu1 }
 0xf64   : > { %v3976_v24 = vpop.f32.mrb[19].mxu1 }
 0xf65   : > { %v3193_v24 = vld [vmem:[%s5192_s12 + $0x38] sm:$0xff] }
 0xf6b   : > { %v2885_v25 = vpop.f32.mrb[20].mxu1 }
 0xf6c   : > { %v2889_v26 = vmul.f32 0.35355338, %v2885_v25  ;;  %v3983_v27 = vpop.f32.mrb[21].mxu1 }
 0xf6e   : > { %v2890_v28 = vadd.f32 %v2889_v26, %v5390_v30  ;;  %v3752_v26 = vld [vmem:[%s5726_s29] ss:$0 sm:$0xff] }
 0xf70   : > { %v2891_v18 = vsel %vm2019_vm4, %v2890_v28, -inf }
 0xf71   : > { %2892 = vmax.xlane.f32.xlu1 %v2891_v18 }
 0xf82   : > { %2982 = vrot.lane.b32.xlu1 %v2803_v23, %s4634_s30  ;;  %s5724_s30 = sld [smem:[#allocation46_spill]]  ;;  %v3192_v23 = vld [vmem:[%s5192_s12 + $0x30] sm:$0xff] }
 0xf83   : > { %v4108_v25 = vpack.c.bf16 %v3193_v24, %v3192_v23 }
 0xffe   : > { %v2893_v29 = vpop.xlane.xlu1 %2892 }
 0xfff   : > { %v2894_v31 = vsub.f32 %v2890_v28, %v2893_v29 }
0x1001   : > { %v2895_v32 = vmul.f32 1.442695, %v2894_v31 }
0x1002   : > { %v2983_v46 = vpop.permute.xlu1 %2982 }
0x1003   : > { %4295 = vpow2.f32 %v2895_v32 }
0x100d   : > { %v4296_v33 = vpop.eup %4295 }
0x100e   : > { %v2897_v34 = vsel %vm2019_vm4, %v4296_v33, 0.0 }
0x100f   : > { %2898 = vadd.xlane.f32.xlu0 %v2897_v34 }
0x1025   : > { %2978 = vrot.lane.b32.xlu0 %v2633_v63, %s4633_s1 }
0x109c   : > { %v2899_v30 = vpop.xlane.xlu0 %2898 }
0x109d   : > { %4297 = vrcp.f32 %v2899_v30 }
0x10a0   : > { %v2979_v45 = vpop.permute.xlu0 %2978 }
0x10a1   : > { %v2989_v47 = vsel %vm1363_vm3, %v5416_v61, %v2979_v45  ;;  %v3101_v61 = vld [vmem:[%s5720_s21] sm:$0xff] }
0x10a2   : > { %v2990_v48 = vsel %vm2019_vm4, %v2989_v47, %v2983_v46  ;;  %v4093_v63 = vpack.c.bf16 %v3102_v62, %v3101_v61  ;;  %v3757_v45 = vld [vmem:[%s5728_s13] ss:$0 sm:$0xff] (!%p3756_p5) }
0x10a3   : > { %v3758_v47 = vld [vmem:[%s5729_s22] ss:$0 sm:$0xff] (!%p3756_p5) }
0x10a4   : > { %4094 = vmatpush3.bf16.msra.mxu1 %v4093_v63 }
0x10a5   : > { %4095 = vmatprep.subr.bf16.mxu1 %v4627_v14 }
0x10a7   : > { %v4298_v35 = vpop.eup %4297 }
0x10a8   : > { %v2901_v36 = vmul.f32 %v4298_v35, %v4296_v33 }
0x10aa   : > { %3989 = vmatmul.mubr.msk.f32.vlgmr.msra.gmra.mrb[16].mxu0 %vm2019_vm4, %v2901_v36 }
0x10ab   : > { %3999 = vmatprep.mubr.msk.f32.mxu0 %vm4628_vm2, %v4629_v17  ;;  %4088 = vmatpush3.bf16.msra.mxu0 %v4087_v40 }
0x10ac   : > { %4089 = vmatprep.subr.bf16.mxu0 %v4627_v14 }
0x10af   : > { %4091 = vmatpush3.bf16.msra.mxu0 %v4090_v42 }
0x10b0   : > { %4098 = vmatprep.subr.bf16.mxu0 %v4627_v14 }
0x117d   : > { %v2973_v43 = vpop.f32.mrb[16].mxu0 }
0x117e   : > { %2986 = vrot.lane.b32.xlu1 %v2973_v43, %s4635_s3  ;;  %v3990_v44 = vpop.f32.mrb[17].mxu0  ;;  %s5725_s3 = scalar_lea.vmem %s5724_s30, %s5119_s25  ;;  %s5727_s25 = scalar_lea.vmem [#allocation11], %s5082_s23 }
0x117f   : > { %v3751_v22 = vld [vmem:[%s5725_s3] ss:$0 sm:$0xff] }
0x1180   : > { %v3755_v32 = vld [vmem:[%s5727_s25] ss:$0 sm:$0xff] }
0x11f0   : > { %v2987_v49 = vpop.permute.xlu1 %2986 }
0x11f1   : > { %v2991_v50 = vsel %vm2021_vm5, %v2990_v48, %v2987_v49 }
0x11f2   : > { %4000 = vmatmul.mubr.msk.f32.vlgmr.msra.gmra.mrb[18].mxu0 %vm1245_vm1, %v2991_v50 }
0x11f3   : > { %4029 = vmatprep.mubr.msk.f32.mxu0 %vm4628_vm2, %v4629_v17  ;;  %4100 = vmatpush3.bf16.msra.mxu0 %v4099_v6 }
0x11f4   : > { %4101 = vmatprep.subr.bf16.mxu0 %v4627_v14 }
0x11f7   : > { %4103 = vmatpush3.bf16.msra.mxu0 %v4102_v8 }
0x11f8   : > { %4104 = vmatprep.subr.bf16.mxu0 %v4627_v14 }
0x11fb   : > { %4106 = vmatpush3.bf16.msra.mxu0 %v4105_v11 }
0x11fc   : > { %4107 = vmatprep.subr.bf16.mxu0 %v4627_v14 }
0x11ff   : > { %4109 = vmatpush3.bf16.msra.mxu0 %v4108_v25 }
0x12c5   : > { %v3067_v53 = vpop.f32.mrb[18].mxu0 }
0x12c6   : > { %v3068_v54 = vadd.f32 %v3748_v52, %v3067_v53  ;;  %v4001_v55 = vpop.f32.mrb[19].mxu0 }
0x12c8   : > { %v3071_v56 = vadd.f32 %v3068_v54, %v5323_v51  ;;  %v3103_v51 = vld [vmem:[%s5720_s21 + $0x10] sm:$0xff] }
0x12c9   : > { %v4096_v1 = vpack.c.bf16 %v3104_v0, %v3103_v51 }
0x12ca   : > { %v3074_v57 = vsel %vm1245_vm1, %v3071_v56, 0.0 }
0x12cb   : > { %3075 = vadd.xlane.f32.xlu0 %v3074_v57  ;;  %4097 = vmatpush3.bf16.msra.mxu1 %v4096_v1 }
0x1358   : > { %v3076_v4 = vpop.xlane.xlu0 %3075 }
0x1359   : > { %v3077_v58 = vmul.f32 0.03125, %v3076_v4 }
0x135b   : > { %v3078_v59 = vsub.f32 %v3071_v56, %v3077_v58 }
0x135d   : > { %v3079_v60 = vmul.f32 %v3078_v59, %v3078_v59 }
0x135f   : > { %v3080_v17 = vsel %vm1245_vm1, %v3079_v60, 0.0 }
0x1360   : > { %3081 = vadd.xlane.f32.xlu1 %v3080_v17 }
0x13ed   : > { %v3082_v12 = vpop.xlane.xlu1 %3081 }
0x13ee   : > { %v3083_v13 = vmul.f32 0.03125, %v3082_v12 }
0x13f0   : > { %v3084_v15 = vadd.f32 1e-05, %v3083_v13 }
0x13f2   : > { %4299 = vrsqrt.f32 %v3084_v15 }
0x13fc   : > { %v4300_v16 = vpop.eup %4299 }
0x13fd   : > { %v3086_v21 = vmul.f32 %v4300_v16, %v3078_v59 }
0x13ff   : > { %v3093_v20 = vmul.f32 %v3750_v19, %v3086_v21 }
0x1401   : > { %v3100_v14 = vadd.f32 %v3751_v22, %v3093_v20 }
0x1403   : > { %4011 = vmatmul.mubr.msk.f32.vlgmr.msra.gmra.mrb[22].mxu1 %vm1245_vm1, %v3100_v14 }
0x14d6   : > { %v3181_v27 = vpop.f32.mrb[22].mxu1 }
0x14d7   : > { %v3182_v28 = vadd.f32 %v3752_v26, %v3181_v27  ;;  %v4012_v18 = vpop.f32.mrb[23].mxu1 }
0x14d9   : > { %v3185_v29 = vmax.f32 %v3182_v28, 0.0 }
0x14db   : > { %4030 = vmatmul.mubr.msk.f32.vlgmr.msra.gmra.mrb[20].mxu0 %vm3194_vm7, %v3185_v29 }
0x15ab   : > { %3280 = sbr.rel (%p3756_p5) target bundleno = 5869 (0x16ed), region = 152 }
0x15ae   : > { %v3264_v31 = vpop.f32.mrb[20].mxu0 }
0x15af   : > { %v3268_v33 = vadd.f32 %v3264_v31, %v3071_v56  ;;  %v4031_v34 = vpop.f32.mrb[21].mxu0 }
0x15b1   : > { %v3276_v30 = vadd.f32 %v3755_v32, %v3268_v33 }
0x15b3   : > { %v3283_v35 = vsel %vm1245_vm1, %v3276_v30, 0.0 }
0x15b4   : > { %3284 = vadd.xlane.f32.xlu0 %v3283_v35 }
0x1641   : > { %v3285_v36 = vpop.xlane.xlu0 %3284 }
0x1642   : > { %v3286_v37 = vmul.f32 0.03125, %v3285_v36 }
0x1644   : > { %v3287_v38 = vsub.f32 %v3276_v30, %v3286_v37 }
0x1646   : > { %v3288_v39 = vmul.f32 %v3287_v38, %v3287_v38 }
0x1648   : > { %v3289_v40 = vsel %vm1245_vm1, %v3288_v39, 0.0 }
0x1649   : > { %3290 = vadd.xlane.f32.xlu0 %v3289_v40 }
0x16d6   : > { %v3291_v41 = vpop.xlane.xlu0 %3290 }
0x16d7   : > { %v3292_v42 = vmul.f32 0.03125, %v3291_v41 }
0x16d9   : > { %v3293_v43 = vadd.f32 1e-05, %v3292_v42 }
0x16db   : > { %4301 = vrsqrt.f32 %v3293_v43 }
0x16e5   : > { %v4302_v44 = vpop.eup %4301 }
0x16e6   : > { %v3295_v46 = vmul.f32 %v4302_v44, %v3287_v38 }
0x16e8   : > { %v3302_v48 = vmul.f32 %v3757_v45, %v3295_v46 }
0x16ea   : > { %v3309_v49 = vadd.f32 %v3758_v47, %v3302_v48 }
0x16ec   : > { %3310 = vst.msk [vmem:[%s5194_s16] sm:$0xff] %vm1245_vm1, %v3309_v49 }
0x16ed PF: > { %p3759_p8 = scmp.ge.s32.totalorder %s4601_s26, 1 }
0x16ee   : > { %3315 = vst.msk [vmem:[%s5194_s16] sm:$0xff] (!%p3759_p8), %vm1245_vm1, %v3276_v30 }
0x16ef   : > { %3314 = sbr.rel (%p3759_p8) target bundleno = 5878 (0x16f6), region = 156 }
0x16f6 PF: > { %s5730_s6 = sld [smem:[#allocation24_spill]]  ;;  %s5731_s8 = sld [smem:[#allocation20_spill]] }
0x16f7   : > { %s5732_s17 = sld [smem:[#allocation32_spill]]  ;;  %s5733_s11 = sld [smem:[#allocation59_spill]] }
0x16f8   : > { %s3330_s15 = sshll.u32 %s5194_s16, 4  ;;  %s4636_s5 = smov [#allocation13]   ;;  %s3331_s15 = int_to_ptr.vmem [resolvable:$true] %s3330_s15 }
0x16f9   : > { %s4483_s26 = scalar_lea.vmem %s3331_s15, 128  ;;  %s4487_s4 = sshll.u32 %s4636_s5, 4  ;;  %s4488_s4 = int_to_ptr.vmem [resolvable:$false] %s4487_s4 }
0x16fa   : > { %p4484_p10 = scmp.ne.s32.totalorder %s3331_s15, %s4483_s26  ;;  %s4489_s0 = scalar_lea.vmem %s4488_s4, 256 }
0x16fb   : > { %p4490_p3 = scmp.lt.s32.totalorder %s3331_s15, %s4488_s4  ;;  %p4491_p2 = scmp.lt.s32.totalorder %s4489_s0, %s4483_s26 }
0x16fc   : > { %s3761_s19 = sshll.u32 %s5730_s6, 7  ;;  %s5734_s14 = sand.u32 1, %s5731_s8  }
0x16fd   : > { %s5511_s24 = scalar_lea.hbm %s5733_s11, %s3761_s19  ;;  %s3317_s21 = scalar_lea.sflag [#allocation4], %s5734_s14 }
0x16fe   : > { %p5735_p11 = scmp.ne.s32.totalorder %s5732_s17, 0  ;;  %p4492_p13 = por %p4491_p2, %p4490_p3 }
0x1700   : > { %p4485_p0 = pnand %p4484_p10, %p5735_p11 }
0x1702   : > { %p4486_p12 = pneg %p4485_p0 }
0x1704   : > { %p4493_p1 = pnand %p4492_p13, %p4486_p12 }
0x1706   : > { %4496 = shalt.err (!%p4493_p1)
}
0x1707   : > { %s4497_s16 = scalar_lea.hbm %s5511_s24, 128  ;;  %s4501_s28 = scalar_lea.hbm %s5733_s11, 256 }
0x1708   : > { %p4498_p6 = scmp.ne.s32.totalorder %s5511_s24, %s4497_s16  ;;  %p4502_p4 = scmp.lt.u32.totalorder %s5511_s24, %s5733_s11 }
0x1709   : > { %p4503_p5 = scmp.lt.u32.totalorder %s4501_s28, %s4497_s16  ;;  %p4505_p10 = scmp.lt.u32.totalorder %s4497_s16, %s5511_s24 }
0x170a   : > { %p4499_p9 = pnand %p4498_p6, %p5735_p11 }
0x170b   : > { %p4504_p8 = por %p4503_p5, %p4502_p4 }
0x170c   : > { %p4500_p7 = pneg %p4499_p9 }
0x170d   : > { %p4506_p0 = por %p4505_p10, %p4504_p8 }
0x170f   : > { %p4507_p12 = pnand %p4506_p0, %p4500_p7 }
0x1711   : > { %4510 = shalt.err (!%p4507_p12)
}
0x1712   : > { %4122 = dma.vmem_to_hbm [thread:$0]  (%p5735_p11), %s3331_s15, 128, %s5511_s24, %s3317_s21  }
0x1713 PF: > { %s5736_s3 = sld [smem:[#allocation27_spill]]  ;;  %s5737_s29 = sld [smem:[#allocation19_spill]] }
0x1714   : > { %s5738_s25 = sld [smem:[#allocation33_spill]] }
0x1719   : > { %p4148_p3 = scmp.ge.s32.totalorder %s5736_s3, 2  ;;  %s3342_s23 = sand.u32 1, %s5737_s29  }
0x171a   : > { %p5739_p2 = scmp.ne.s32.totalorder %s5738_s25, 0  ;;  %s3343_s12 = scalar_lea.sflag [#allocation4], %s3342_s23 }
0x171c   : > { %p4144_p13 = pnand %p4148_p3, %p5739_p2 }
0x171e   : > { %4572 = dma.done.wait (!%p4144_p13), %s3343_s12, 128  }
0x171f   : > { %4574 = vsyncadd (!%p4144_p13), %s3343_s12, 4294967168  ;;  %s50_s4 = sadd.s32 1, %s5736_s3   ;;  %s5740_s29 = sld [smem:[#allocation20_spill]] }
0x1720   : > { %p47_p1 = scmp.ge.s32.totalorder %s50_s4, 6   ;;  %s5741_s2 = sld [smem:[#allocation21_spill]] }
0x1721   : > { %s5742_s6 = sld [smem:[#allocation31_spill]]  ;;  %s5743_s30 = sld [smem:[#allocation22_spill]] }
0x1722   : > { %s5744_s7 = sld [smem:[#allocation23_spill]]  ;;  %s5745_s3 = sld [smem:[#allocation30_spill]] }
0x1723   : > { %s5746_s26 = sld [smem:[#allocation25_spill]]  ;;  %s5747_s1 = sld [smem:[#allocation26_spill]] }
0x1724   : > { %s5748_s8 = sld [smem:[#allocation28_spill]]  ;;  %s5749_s27 = sld [smem:[#allocation29_spill]] }
0x1725   :  { %49 = sbr.rel (!%p47_p1) target bundleno = 41 (0x29), region = 286 }
0x172c   :  { %3348 = vsyncpa [#allocation3], 1 }
0x172d   :  { %3350 = vsyncpa [#allocation3 + $0x1], 1 }
0x172e   :  { %3351 = vsyncpa [#allocation6], 1 }
0x172f   :  { %3353 = vsyncpa [#allocation6 + $0x1], 1 }
0x1730   :  { %3354 = vsyncpa [#allocation9], 1 }
0x1731   :  { %3356 = vsyncpa [#allocation9 + $0x1], 1 }
0x1732   :  { %3357 = vsyncpa [#allocation12], 1 }
0x1733   :  { %3359 = vsyncpa [#allocation12 + $0x1], 1 }
0x1734   :  { %3360 = vsyncpa [#allocation4], 1 }
0x1735   :  { %3362 = vsyncpa [#allocation4 + $0x1], 1 }

</bundles_post_ra>
